<compile_context>
chip_gen: v7x
topology: tpu7x:2x2x1
jax: 0.10.0
libtpu: 0.0.40
codegen_flags: <defaults>
</compile_context>

<pallas_src>
import math

import jax
import jax.numpy as jnp
from jax.experimental import pallas as pl
from jax.experimental.pallas import tpu as pltpu

# ----------------------- small synthetic BERT config -----------------------
VOCAB = 50
MAX_POS = 16
TYPE_VOCAB = 2
HIDDEN = 32            # stands in for 768
N_LAYERS = 2
N_HEADS = 2
HEAD_DIM = HIDDEN // N_HEADS
INTERMEDIATE = 64
LN_EPS = 1e-12
BATCH = 2
SEQ = 8
BS = BATCH * SEQ
N_TOWERS = 2
VEC_W = 3 * HIDDEN     # width of the packed per-layer vector slab rows


# ------------------------------ in-kernel helpers ------------------------------
def _ln(x, g, b):
    mu = jnp.mean(x, axis=-1, keepdims=True)
    xc = x - mu
    var = jnp.mean(xc * xc, axis=-1, keepdims=True)
    return xc * jax.lax.rsqrt(var + LN_EPS) * g + b


def _gelu(x):
    # TODO(synk): HF BERT uses erf-GELU; tanh approximation differs at ~1e-3 level.
    return 0.5 * x * (1.0 + jnp.tanh(0.7978845608028654 * (x + 0.044715 * x * x * x)))


# ------------------------------- Pallas kernel -------------------------------
def _tower_kernel(h0_ref, mask_ref, qkvw_ref, aow_ref, iw_ref, ow_ref,
                  vec_ref, tower_ref, out_ref):
    """One full BERT tower (emb-LN -> N encoder layers -> CLS pooler), resident in VMEM.

    TODO(synk): this all-weights-resident layout only works at synthetic size; a real
    BERT-base tower must stream per-layer weights (grid=(tower, layer)) to fit VMEM.
    """
    tw = tower_ref[0]                                   # [3+H, H] f32: emb_g, emb_b, pool_b, pool_w
    h = _ln(h0_ref[0], tw[0:1, :], tw[1:2, :])          # [BS, H] f32

    # Hoisted additive-mask broadcast (JAX does not CSE broadcast_in_dim).
    mask3 = jnp.broadcast_to(mask_ref[0][:, None, :], (BATCH, SEQ, SEQ))

    for l in range(N_LAYERS):
        vec_l = vec_ref[0, l]                           # [8, 3H] f32
        qkv_b = vec_l[0:1, :]                           # [1, 3H] (q-part already scaled)
        ao_b = vec_l[1:2, :HIDDEN]
        ag, ab = vec_l[2:3, :HIDDEN], vec_l[3:4, :HIDDEN]
        ib = vec_l[4:5, :INTERMEDIATE]
        ob = vec_l[5:6, :HIDDEN]
        og, ogb = vec_l[6:7, :HIDDEN], vec_l[7:8, :HIDDEN]

        hb = h.astype(jnp.bfloat16)
        attn = jnp.zeros((BS, HIDDEN), jnp.float32)
        for hh in range(N_HEADS):
            base = (l * N_HEADS + hh) * 3
            c0 = hh * HEAD_DIM
            # Per-head pre-split weights: activations are never lane-sliced in-kernel.
            qh = (jnp.dot(hb, qkvw_ref[0, base + 0], preferred_element_type=jnp.float32)
                  + qkv_b[:, c0:c0 + HEAD_DIM]).reshape(BATCH, SEQ, HEAD_DIM)
            kh = (jnp.dot(hb, qkvw_ref[0, base + 1], preferred_element_type=jnp.float32)
                  + qkv_b[:, HIDDEN + c0:HIDDEN + c0 + HEAD_DIM]).reshape(BATCH, SEQ, HEAD_DIM)
            vh = (jnp.dot(hb, qkvw_ref[0, base + 2], preferred_element_type=jnp.float32)
                  + qkv_b[:, 2 * HIDDEN + c0:2 * HIDDEN + c0 + HEAD_DIM]
                  ).reshape(BATCH, SEQ, HEAD_DIM)

            s = jnp.einsum('bqd,bkd->bqk', qh.astype(jnp.bfloat16), kh.astype(jnp.bfloat16),
                           preferred_element_type=jnp.float32) + mask3
            s = s - jnp.max(s, axis=-1, keepdims=True)
            p = jnp.exp(s)
            p = p / jnp.sum(p, axis=-1, keepdims=True)          # exact divide (parity)
            ch = jnp.einsum('bqk,bkd->bqd', p.astype(jnp.bfloat16), vh.astype(jnp.bfloat16),
                            preferred_element_type=jnp.float32)  # [B, S, dH]
            # per-head row-block of W_out, accumulated == merge_heads(ctx) @ W_out
            attn = attn + jnp.dot(ch.reshape(BS, HEAD_DIM).astype(jnp.bfloat16),
                                  aow_ref[0, l * N_HEADS + hh],
                                  preferred_element_type=jnp.float32)
        attn = attn + ao_b
        h = _ln(attn + h, ag, ab)

        inter = _gelu(jnp.dot(h.astype(jnp.bfloat16), iw_ref[0, l],
                              preferred_element_type=jnp.float32) + ib)
        ffn = jnp.dot(inter.astype(jnp.bfloat16), ow_ref[0, l],
                      preferred_element_type=jnp.float32) + ob
        h = _ln(ffn + h, og, ogb)

    # CLS-only pooling: gather CLS rows first, one matmul, one contiguous store.
    cls = jnp.concatenate([h[b * SEQ:b * SEQ + 1, :] for b in range(BATCH)], axis=0)   # [B, H]
    pooled = jnp.tanh(jnp.dot(cls, tw[3:, :], preferred_element_type=jnp.float32)
                      + tw[2:3, :])
    out_ref[0] = pooled


# -------------------------------- kernel wrapper --------------------------------
def _tower_spec(shape):
    nd = len(shape)
    block = (1,) + tuple(shape[1:])
    return pl.BlockSpec(block, lambda t: (t,) + (0,) * (nd - 1))


def _tower_cost(args):
    per_layer = (2 * BS * HIDDEN * HEAD_DIM * 3 * N_HEADS              # per-head q/k/v proj
                 + 2 * 2 * BATCH * SEQ * SEQ * HEAD_DIM * N_HEADS      # scores + ctx
                 + 2 * BS * HEAD_DIM * HIDDEN * N_HEADS                # attn-out row blocks
                 + 2 * BS * HIDDEN * INTERMEDIATE * 2)                 # ffn in + out
    flops = N_TOWERS * (N_LAYERS * per_layer + 2 * BATCH * HIDDEN * HIDDEN)
    transc = N_TOWERS * (N_LAYERS * (N_HEADS * BATCH * SEQ * SEQ + BS * INTERMEDIATE)
                         + BATCH * HIDDEN)
    nbytes = sum(a.size * a.dtype.itemsize for a in args) + N_TOWERS * BATCH * HIDDEN * 4
    return flops, transc, nbytes


def run_towers(h0, addmask, qkvw, aow, iw, ow, vec, tower):
    args = (h0, addmask, qkvw, aow, iw, ow, vec, tower)
    flops, transc, nbytes = _tower_cost(args)
    return pl.pallas_call(
        _tower_kernel,
        grid=(N_TOWERS,),
        out_shape=jax.ShapeDtypeStruct((N_TOWERS, BATCH, HIDDEN), jnp.float32),
        in_specs=[_tower_spec(a.shape) for a in args],
        out_specs=pl.BlockSpec((1, BATCH, HIDDEN), lambda t: (t, 0, 0)),
        compiler_params=pltpu.CompilerParams(dimension_semantics=("parallel",)),
        cost_estimate=pl.CostEstimate(flops=flops, transcendentals=transc,
                                      bytes_accessed=nbytes),
    )(*args)


# ------------------------------ parameter init ------------------------------
def dense_params(key, din, dout):
    kw, kb = jax.random.split(key)
    w = jax.random.normal(kw, (din, dout), jnp.float32) * 0.02
    b = jax.random.normal(kb, (dout,), jnp.float32) * 0.02
    return w, b


def init_bert(key):
    keys = jax.random.split(key, 4 + N_LAYERS)
    p = {
        "word_emb": jax.random.normal(keys[0], (VOCAB, HIDDEN), jnp.float32) * 0.02,
        "pos_emb": jax.random.normal(keys[1], (MAX_POS, HIDDEN), jnp.float32) * 0.02,
        "type_emb": jax.random.normal(keys[2], (TYPE_VOCAB, HIDDEN), jnp.float32) * 0.02,
        "emb_ln_g": jnp.ones((HIDDEN,), jnp.float32),
        "emb_ln_b": jnp.zeros((HIDDEN,), jnp.float32),
        "layers": [],
        "pooler": dense_params(keys[3], HIDDEN, HIDDEN),
    }
    for l in range(N_LAYERS):
        lk = jax.random.split(keys[4 + l], 6)
        p["layers"].append({
            "q": dense_params(lk[0], HIDDEN, HIDDEN),
            "k": dense_params(lk[1], HIDDEN, HIDDEN),
            "v": dense_params(lk[2], HIDDEN, HIDDEN),
            "attn_out": dense_params(lk[3], HIDDEN, HIDDEN),
            "attn_ln_g": jnp.ones((HIDDEN,), jnp.float32),
            "attn_ln_b": jnp.zeros((HIDDEN,), jnp.float32),
            "inter": dense_params(lk[4], HIDDEN, INTERMEDIATE),
            "out": dense_params(lk[5], INTERMEDIATE, HIDDEN),
            "out_ln_g": jnp.ones((HIDDEN,), jnp.float32),
            "out_ln_b": jnp.zeros((HIDDEN,), jnp.float32),
        })
    return p


def pack_tower(p):
    """Pack one tower's params into 6 kernel-friendly slabs.

    - per-head q/k/v weight blocks (attention scale folded into q weight & bias), bf16
    - per-head attention-output row blocks, bf16
    - FFN weights, bf16
    - one [L, 8, 3H] f32 slab for every per-layer bias / LN vector (zero-padded rows)
    - one [3+H, H] f32 per-tower slab: emb-LN gamma/beta, pooler bias, pooler weight
    """
    scale = 1.0 / math.sqrt(HEAD_DIM)

    def pad_row(v):
        return jnp.pad(v, (0, VEC_W - v.shape[0]))[None, :]

    qkvw, aow, iw, ow, vec = [], [], [], [], []
    for layer in p["layers"]:
        qw, qb = layer["q"]
        kw, kb = layer["k"]
        vw, vb = layer["v"]
        aw, ao_b = layer["attn_out"]
        for hh in range(N_HEADS):
            c0 = hh * HEAD_DIM
            qkvw.append(jnp.stack([qw[:, c0:c0 + HEAD_DIM] * scale,
                                   kw[:, c0:c0 + HEAD_DIM],
                                   vw[:, c0:c0 + HEAD_DIM]]))         # [3, H, dH]
            aow.append(aw[c0:c0 + HEAD_DIM, :])                       # [dH, H]
        iw.append(layer["inter"][0])
        ow.append(layer["out"][0])
        vec.append(jnp.concatenate([
            pad_row(jnp.concatenate([qb * scale, kb, vb])),           # row 0: fused qkv bias
            pad_row(ao_b),
            pad_row(layer["attn_ln_g"]), pad_row(layer["attn_ln_b"]),
            pad_row(layer["inter"][1]), pad_row(layer["out"][1]),
            pad_row(layer["out_ln_g"]), pad_row(layer["out_ln_b"]),
        ], axis=0))                                                    # [8, 3H]

    pw, pb = p["pooler"]
    tower = jnp.concatenate([p["emb_ln_g"][None, :], p["emb_ln_b"][None, :],
                             pb[None, :], pw], axis=0)                 # [3+H, H]

    return (jnp.stack(qkvw).astype(jnp.bfloat16).reshape(N_LAYERS * N_HEADS * 3,
                                                         HIDDEN, HEAD_DIM),
            jnp.stack(aow).astype(jnp.bfloat16),                       # [L*nH, dH, H]
            jnp.stack(iw).astype(jnp.bfloat16),                        # [L, H, I]
            jnp.stack(ow).astype(jnp.bfloat16),                        # [L, I, H]
            jnp.stack(vec),                                            # [L, 8, 3H] f32
            tower)                                                     # [3+H, H]  f32


# -------------------------------- forward pass --------------------------------
def _embed(p, input_ids):
    # embedding gathers stay in plain JAX (glue)
    # TODO(synk): token_type_ids assumed all-zero (HF default when not provided)
    h = (jnp.take(p["word_emb"], input_ids, axis=0)
         + p["pos_emb"][None, :SEQ, :]
         + p["type_emb"][0][None, None, :])
    return h.reshape(BS, HIDDEN).astype(jnp.float32)


def multimodal_bert_forward(params, url_ids, url_mask, html_ids, html_mask):
    h0 = jnp.stack([_embed(params["url_bert"], url_ids),
                    _embed(params["html_bert"], html_ids)], axis=0)            # [2, BS, H]
    addmask = jnp.stack([(1.0 - url_mask.astype(jnp.float32)) * -10000.0,
                         (1.0 - html_mask.astype(jnp.float32)) * -10000.0])    # [2, B, S]
    packed = tuple(jnp.stack([u, m], axis=0)
                   for u, m in zip(pack_tower(params["url_bert"]),
                                   pack_tower(params["html_bert"])))

    pooled = run_towers(h0, addmask, *packed)                                  # [2, B, H]

    # fc -> dropout -> classifier head: ~4 KFLOPs, done with plain XLA dots
    # (per perf review: a second micro pallas_call launch costs more than it saves).
    fc_w, fc_b = params["fc"]
    cls_w, cls_b = params["classifier"]
    combined = jnp.concatenate([pooled[0], pooled[1]], axis=-1)                # [B, 2H]
    x = combined @ fc_w + fc_b
    # TODO(synk): nn.Dropout(0.1) treated as identity (eval/inference mode)
    return x @ cls_w + cls_b                                                   # [B, 1]


# ------------------------------------ main ------------------------------------
if __name__ == "__main__":
    key = jax.random.PRNGKey(0)
    kp, kd = jax.random.split(key)
    k1, k2, k3, k4 = jax.random.split(kp, 4)
    params = {
        "url_bert": init_bert(k1),
        "html_bert": init_bert(k2),
        "fc": dense_params(k3, 2 * HIDDEN, HIDDEN),
        "classifier": dense_params(k4, HIDDEN, 1),
    }

    kd1, kd2 = jax.random.split(kd)
    url_input_ids = jax.random.randint(kd1, (BATCH, SEQ), 0, VOCAB)
    html_input_ids = jax.random.randint(kd2, (BATCH, SEQ), 0, VOCAB)
    url_attention_mask = jnp.ones((BATCH, SEQ), jnp.int32).at[:, SEQ - 2:].set(0)
    html_attention_mask = jnp.ones((BATCH, SEQ), jnp.int32)

    logits = jax.jit(multimodal_bert_forward)(params, url_input_ids, url_attention_mask,
                                              html_input_ids, html_attention_mask)
    jax.block_until_ready(logits)
    assert logits.shape == (BATCH, 1) and logits.dtype == jnp.float32
    print("KERNEL_OK")
</pallas_src>

<mosaic_0001>
module attributes {stable_mosaic.version = 11 : i64} {
  func.func @_tower_kernel(%arg0: i32, %arg1: memref<1x16x32xf32, #tpu.memory_space<vmem>>, %arg2: memref<1x2x8xf32, #tpu.memory_space<vmem>>, %arg3: memref<1x12x32x16xbf16, #tpu.memory_space<vmem>>, %arg4: memref<1x4x16x32xbf16, #tpu.memory_space<vmem>>, %arg5: memref<1x2x32x64xbf16, #tpu.memory_space<vmem>>, %arg6: memref<1x2x64x32xbf16, #tpu.memory_space<vmem>>, %arg7: memref<1x2x8x96xf32, #tpu.memory_space<vmem>>, %arg8: memref<1x35x32xf32, #tpu.memory_space<vmem>>, %arg9: memref<1x2x32xf32, #tpu.memory_space<vmem>>) attributes {dimension_semantics = [#tpu.dimension_semantics<parallel>], iteration_bounds = array<i64: 2>, scalar_prefetch = 0 : i64, scratch_operands = 0 : i64, tpu.core_type = #tpu.core_type<tc>, window_params = [{transform_indices = @transform_0, window_bounds = array<i64: 1, 16, 32>}, {transform_indices = @transform_1, window_bounds = array<i64: 1, 2, 8>}, {transform_indices = @transform_2, window_bounds = array<i64: 1, 12, 32, 16>}, {transform_indices = @transform_3, window_bounds = array<i64: 1, 4, 16, 32>}, {transform_indices = @transform_4, window_bounds = array<i64: 1, 2, 32, 64>}, {transform_indices = @transform_5, window_bounds = array<i64: 1, 2, 64, 32>}, {transform_indices = @transform_6, window_bounds = array<i64: 1, 2, 8, 96>}, {transform_indices = @transform_7, window_bounds = array<i64: 1, 35, 32>}, {transform_indices = @transform_8, window_bounds = array<i64: 1, 2, 32>}]} {
    %c0 = arith.constant 0 : index
    %c0_0 = arith.constant 0 : index
    %c0_1 = arith.constant 0 : index
    %0 = vector.load %arg8[%c0, %c0_0, %c0_1] : memref<1x35x32xf32, #tpu.memory_space<vmem>>, vector<1x35x32xf32>
    %1 = vector.shape_cast %0 : vector<1x35x32xf32> to vector<35x32xf32>
    %c0_2 = arith.constant 0 : index
    %c0_3 = arith.constant 0 : index
    %c0_4 = arith.constant 0 : index
    %2 = vector.load %arg1[%c0_2, %c0_3, %c0_4] : memref<1x16x32xf32, #tpu.memory_space<vmem>>, vector<1x16x32xf32>
    %3 = vector.shape_cast %2 : vector<1x16x32xf32> to vector<16x32xf32>
    %4 = vector.extract_strided_slice %1 {offsets = [0, 0], sizes = [1, 32], strides = [1, 1]} : vector<35x32xf32> to vector<1x32xf32>
    %5 = vector.extract_strided_slice %1 {offsets = [1, 0], sizes = [1, 32], strides = [1, 1]} : vector<35x32xf32> to vector<1x32xf32>
    %cst = arith.constant dense<0.000000e+00> : vector<16xf32>
    %6 = vector.multi_reduction <add>, %3, %cst [1] : vector<16x32xf32> to vector<16xf32>
    %7 = vector.shape_cast %6 : vector<16xf32> to vector<16x1xf32>
    %cst_5 = arith.constant 3.200000e+01 : f32
    %8 = vector.broadcast %cst_5 : f32 to vector<16x1xf32>
    %9 = arith.divf %7, %8 : vector<16x1xf32>
    %10 = vector.broadcast %9 : vector<16x1xf32> to vector<16x32xf32>
    %11 = arith.subf %3, %10 : vector<16x32xf32>
    %12 = arith.mulf %11, %11 : vector<16x32xf32>
    %cst_6 = arith.constant dense<0.000000e+00> : vector<16xf32>
    %13 = vector.multi_reduction <add>, %12, %cst_6 [1] : vector<16x32xf32> to vector<16xf32>
    %14 = vector.shape_cast %13 : vector<16xf32> to vector<16x1xf32>
    %cst_7 = arith.constant 3.200000e+01 : f32
    %15 = vector.broadcast %cst_7 : f32 to vector<16x1xf32>
    %16 = arith.divf %14, %15 : vector<16x1xf32>
    %cst_8 = arith.constant 9.99999996E-13 : f32
    %17 = vector.broadcast %cst_8 : f32 to vector<16x1xf32>
    %18 = arith.addf %16, %17 : vector<16x1xf32>
    %19 = math.rsqrt %18 : vector<16x1xf32>
    %20 = vector.broadcast %19 : vector<16x1xf32> to vector<16x32xf32>
    %21 = arith.mulf %11, %20 : vector<16x32xf32>
    %22 = vector.broadcast %4 : vector<1x32xf32> to vector<16x32xf32>
    %23 = arith.mulf %21, %22 : vector<16x32xf32>
    %24 = vector.broadcast %5 : vector<1x32xf32> to vector<16x32xf32>
    %25 = arith.addf %23, %24 : vector<16x32xf32>
    %c0_9 = arith.constant 0 : index
    %c0_10 = arith.constant 0 : index
    %c0_11 = arith.constant 0 : index
    %26 = vector.load %arg2[%c0_9, %c0_10, %c0_11] : memref<1x2x8xf32, #tpu.memory_space<vmem>>, vector<1x2x8xf32>
    %27 = vector.shape_cast %26 : vector<1x2x8xf32> to vector<2x8xf32>
    %28 = vector.shape_cast %27 : vector<2x8xf32> to vector<2x1x8xf32>
    %29 = vector.shape_cast %28 : vector<2x1x8xf32> to vector<2x1x8xf32>
    %30 = vector.broadcast %29 : vector<2x1x8xf32> to vector<2x8x8xf32>
    %c0_12 = arith.constant 0 : index
    %c0_13 = arith.constant 0 : index
    %c0_14 = arith.constant 0 : index
    %c0_15 = arith.constant 0 : index
    %31 = vector.load %arg7[%c0_12, %c0_13, %c0_14, %c0_15] : memref<1x2x8x96xf32, #tpu.memory_space<vmem>>, vector<1x1x8x96xf32>
    %32 = vector.shape_cast %31 : vector<1x1x8x96xf32> to vector<8x96xf32>
    %33 = vector.extract_strided_slice %32 {offsets = [0, 0], sizes = [1, 96], strides = [1, 1]} : vector<8x96xf32> to vector<1x96xf32>
    %34 = vector.extract_strided_slice %32 {offsets = [1, 0], sizes = [1, 32], strides = [1, 1]} : vector<8x96xf32> to vector<1x32xf32>
    %35 = vector.extract_strided_slice %32 {offsets = [2, 0], sizes = [1, 32], strides = [1, 1]} : vector<8x96xf32> to vector<1x32xf32>
    %36 = vector.extract_strided_slice %32 {offsets = [3, 0], sizes = [1, 32], strides = [1, 1]} : vector<8x96xf32> to vector<1x32xf32>
    %37 = vector.extract_strided_slice %32 {offsets = [4, 0], sizes = [1, 64], strides = [1, 1]} : vector<8x96xf32> to vector<1x64xf32>
    %38 = vector.extract_strided_slice %32 {offsets = [5, 0], sizes = [1, 32], strides = [1, 1]} : vector<8x96xf32> to vector<1x32xf32>
    %39 = vector.extract_strided_slice %32 {offsets = [6, 0], sizes = [1, 32], strides = [1, 1]} : vector<8x96xf32> to vector<1x32xf32>
    %40 = vector.extract_strided_slice %32 {offsets = [7, 0], sizes = [1, 32], strides = [1, 1]} : vector<8x96xf32> to vector<1x32xf32>
    %41 = arith.truncf %25 : vector<16x32xf32> to vector<16x32xbf16>
    %cst_16 = arith.constant 0.000000e+00 : f32
    %42 = vector.broadcast %cst_16 : f32 to vector<16x32xf32>
    %c0_17 = arith.constant 0 : index
    %c0_18 = arith.constant 0 : index
    %c0_19 = arith.constant 0 : index
    %c0_20 = arith.constant 0 : index
    %43 = vector.load %arg3[%c0_17, %c0_18, %c0_19, %c0_20] : memref<1x12x32x16xbf16, #tpu.memory_space<vmem>>, vector<1x1x32x16xbf16>
    %44 = vector.shape_cast %43 : vector<1x1x32x16xbf16> to vector<32x16xbf16>
    %cst_21 = arith.constant dense<0.000000e+00> : vector<16x16xf32>
    %45 = tpu.matmul %41, %44, %cst_21 {dimension_numbers = #tpu.dot_dimension_numbers<[1], [0], [0], [1], [0, 0, 1, 1], [], []>} : vector<16x32xbf16>, vector<32x16xbf16>, vector<16x16xf32> -> vector<16x16xf32>
    %46 = vector.extract_strided_slice %33 {offsets = [0, 0], sizes = [1, 16], strides = [1, 1]} : vector<1x96xf32> to vector<1x16xf32>
    %47 = vector.broadcast %46 : vector<1x16xf32> to vector<16x16xf32>
    %48 = arith.addf %45, %47 : vector<16x16xf32>
    %49 = vector.shape_cast %48 : vector<16x16xf32> to vector<2x8x16xf32>
    %c0_22 = arith.constant 0 : index
    %c1 = arith.constant 1 : index
    %c0_23 = arith.constant 0 : index
    %c0_24 = arith.constant 0 : index
    %50 = vector.load %arg3[%c0_22, %c1, %c0_23, %c0_24] : memref<1x12x32x16xbf16, #tpu.memory_space<vmem>>, vector<1x1x32x16xbf16>
    %51 = vector.shape_cast %50 : vector<1x1x32x16xbf16> to vector<32x16xbf16>
    %cst_25 = arith.constant dense<0.000000e+00> : vector<16x16xf32>
    %52 = tpu.matmul %41, %51, %cst_25 {dimension_numbers = #tpu.dot_dimension_numbers<[1], [0], [0], [1], [0, 0, 1, 1], [], []>} : vector<16x32xbf16>, vector<32x16xbf16>, vector<16x16xf32> -> vector<16x16xf32>
    %53 = vector.extract_strided_slice %33 {offsets = [0, 32], sizes = [1, 16], strides = [1, 1]} : vector<1x96xf32> to vector<1x16xf32>
    %54 = vector.broadcast %53 : vector<1x16xf32> to vector<16x16xf32>
    %55 = arith.addf %52, %54 : vector<16x16xf32>
    %56 = vector.shape_cast %55 : vector<16x16xf32> to vector<2x8x16xf32>
    %c0_26 = arith.constant 0 : index
    %c2 = arith.constant 2 : index
    %c0_27 = arith.constant 0 : index
    %c0_28 = arith.constant 0 : index
    %57 = vector.load %arg3[%c0_26, %c2, %c0_27, %c0_28] : memref<1x12x32x16xbf16, #tpu.memory_space<vmem>>, vector<1x1x32x16xbf16>
    %58 = vector.shape_cast %57 : vector<1x1x32x16xbf16> to vector<32x16xbf16>
    %cst_29 = arith.constant dense<0.000000e+00> : vector<16x16xf32>
    %59 = tpu.matmul %41, %58, %cst_29 {dimension_numbers = #tpu.dot_dimension_numbers<[1], [0], [0], [1], [0, 0, 1, 1], [], []>} : vector<16x32xbf16>, vector<32x16xbf16>, vector<16x16xf32> -> vector<16x16xf32>
    %60 = vector.extract_strided_slice %33 {offsets = [0, 64], sizes = [1, 16], strides = [1, 1]} : vector<1x96xf32> to vector<1x16xf32>
    %61 = vector.broadcast %60 : vector<1x16xf32> to vector<16x16xf32>
    %62 = arith.addf %59, %61 : vector<16x16xf32>
    %63 = vector.shape_cast %62 : vector<16x16xf32> to vector<2x8x16xf32>
    %64 = arith.truncf %49 : vector<2x8x16xf32> to vector<2x8x16xbf16>
    %65 = arith.truncf %56 : vector<2x8x16xf32> to vector<2x8x16xbf16>
    "tpu.trace_start"() <{level = 10 : i32, message = "bqd,bkd->bqk"}> : () -> ()
    %cst_30 = arith.constant dense<0.000000e+00> : vector<2x8x8xf32>
    %66 = tpu.matmul %64, %65, %cst_30 {dimension_numbers = #tpu.dot_dimension_numbers<[2], [2], [1], [1], [0, 0, 0, 1, 1, 1], [0], [0]>} : vector<2x8x16xbf16>, vector<2x8x16xbf16>, vector<2x8x8xf32> -> vector<2x8x8xf32>
    "tpu.trace_stop"() : () -> ()
    %67 = arith.addf %66, %30 : vector<2x8x8xf32>
    %cst_31 = arith.constant dense<0xFF800000> : vector<2x8xf32>
    %68 = vector.multi_reduction <maximumf>, %67, %cst_31 [2] : vector<2x8x8xf32> to vector<2x8xf32>
    %69 = vector.shape_cast %68 : vector<2x8xf32> to vector<2x8x1xf32>
    %70 = vector.broadcast %69 : vector<2x8x1xf32> to vector<2x8x8xf32>
    %71 = arith.subf %67, %70 : vector<2x8x8xf32>
    %72 = math.exp %71 : vector<2x8x8xf32>
    %cst_32 = arith.constant dense<0.000000e+00> : vector<2x8xf32>
    %73 = vector.multi_reduction <add>, %72, %cst_32 [2] : vector<2x8x8xf32> to vector<2x8xf32>
    %74 = vector.shape_cast %73 : vector<2x8xf32> to vector<2x8x1xf32>
    %75 = vector.broadcast %74 : vector<2x8x1xf32> to vector<2x8x8xf32>
    %76 = arith.divf %72, %75 : vector<2x8x8xf32>
    %77 = arith.truncf %76 : vector<2x8x8xf32> to vector<2x8x8xbf16>
    %78 = arith.truncf %63 : vector<2x8x16xf32> to vector<2x8x16xbf16>
    "tpu.trace_start"() <{level = 10 : i32, message = "bqk,bkd->bqd"}> : () -> ()
    %cst_33 = arith.constant dense<0.000000e+00> : vector<2x8x16xf32>
    %79 = tpu.matmul %77, %78, %cst_33 {dimension_numbers = #tpu.dot_dimension_numbers<[2], [1], [1], [2], [0, 0, 0, 1, 1, 2], [0], [0]>} : vector<2x8x8xbf16>, vector<2x8x16xbf16>, vector<2x8x16xf32> -> vector<2x8x16xf32>
    "tpu.trace_stop"() : () -> ()
    %80 = vector.shape_cast %79 : vector<2x8x16xf32> to vector<16x16xf32>
    %81 = arith.truncf %80 : vector<16x16xf32> to vector<16x16xbf16>
    %c0_34 = arith.constant 0 : index
    %c0_35 = arith.constant 0 : index
    %c0_36 = arith.constant 0 : index
    %c0_37 = arith.constant 0 : index
    %82 = vector.load %arg4[%c0_34, %c0_35, %c0_36, %c0_37] : memref<1x4x16x32xbf16, #tpu.memory_space<vmem>>, vector<1x1x16x32xbf16>
    %83 = vector.shape_cast %82 : vector<1x1x16x32xbf16> to vector<16x32xbf16>
    %cst_38 = arith.constant dense<0.000000e+00> : vector<16x32xf32>
    %84 = tpu.matmul %81, %83, %cst_38 {dimension_numbers = #tpu.dot_dimension_numbers<[1], [0], [0], [1], [0, 0, 1, 1], [], []>} : vector<16x16xbf16>, vector<16x32xbf16>, vector<16x32xf32> -> vector<16x32xf32>
    %85 = arith.addf %42, %84 : vector<16x32xf32>
    %c0_39 = arith.constant 0 : index
    %c3 = arith.constant 3 : index
    %c0_40 = arith.constant 0 : index
    %c0_41 = arith.constant 0 : index
    %86 = vector.load %arg3[%c0_39, %c3, %c0_40, %c0_41] : memref<1x12x32x16xbf16, #tpu.memory_space<vmem>>, vector<1x1x32x16xbf16>
    %87 = vector.shape_cast %86 : vector<1x1x32x16xbf16> to vector<32x16xbf16>
    %cst_42 = arith.constant dense<0.000000e+00> : vector<16x16xf32>
    %88 = tpu.matmul %41, %87, %cst_42 {dimension_numbers = #tpu.dot_dimension_numbers<[1], [0], [0], [1], [0, 0, 1, 1], [], []>} : vector<16x32xbf16>, vector<32x16xbf16>, vector<16x16xf32> -> vector<16x16xf32>
    %89 = vector.extract_strided_slice %33 {offsets = [0, 16], sizes = [1, 16], strides = [1, 1]} : vector<1x96xf32> to vector<1x16xf32>
    %90 = vector.broadcast %89 : vector<1x16xf32> to vector<16x16xf32>
    %91 = arith.addf %88, %90 : vector<16x16xf32>
    %92 = vector.shape_cast %91 : vector<16x16xf32> to vector<2x8x16xf32>
    %c0_43 = arith.constant 0 : index
    %c4 = arith.constant 4 : index
    %c0_44 = arith.constant 0 : index
    %c0_45 = arith.constant 0 : index
    %93 = vector.load %arg3[%c0_43, %c4, %c0_44, %c0_45] : memref<1x12x32x16xbf16, #tpu.memory_space<vmem>>, vector<1x1x32x16xbf16>
    %94 = vector.shape_cast %93 : vector<1x1x32x16xbf16> to vector<32x16xbf16>
    %cst_46 = arith.constant dense<0.000000e+00> : vector<16x16xf32>
    %95 = tpu.matmul %41, %94, %cst_46 {dimension_numbers = #tpu.dot_dimension_numbers<[1], [0], [0], [1], [0, 0, 1, 1], [], []>} : vector<16x32xbf16>, vector<32x16xbf16>, vector<16x16xf32> -> vector<16x16xf32>
    %96 = vector.extract_strided_slice %33 {offsets = [0, 48], sizes = [1, 16], strides = [1, 1]} : vector<1x96xf32> to vector<1x16xf32>
    %97 = vector.broadcast %96 : vector<1x16xf32> to vector<16x16xf32>
    %98 = arith.addf %95, %97 : vector<16x16xf32>
    %99 = vector.shape_cast %98 : vector<16x16xf32> to vector<2x8x16xf32>
    %c0_47 = arith.constant 0 : index
    %c5 = arith.constant 5 : index
    %c0_48 = arith.constant 0 : index
    %c0_49 = arith.constant 0 : index
    %100 = vector.load %arg3[%c0_47, %c5, %c0_48, %c0_49] : memref<1x12x32x16xbf16, #tpu.memory_space<vmem>>, vector<1x1x32x16xbf16>
    %101 = vector.shape_cast %100 : vector<1x1x32x16xbf16> to vector<32x16xbf16>
    %cst_50 = arith.constant dense<0.000000e+00> : vector<16x16xf32>
    %102 = tpu.matmul %41, %101, %cst_50 {dimension_numbers = #tpu.dot_dimension_numbers<[1], [0], [0], [1], [0, 0, 1, 1], [], []>} : vector<16x32xbf16>, vector<32x16xbf16>, vector<16x16xf32> -> vector<16x16xf32>
    %103 = vector.extract_strided_slice %33 {offsets = [0, 80], sizes = [1, 16], strides = [1, 1]} : vector<1x96xf32> to vector<1x16xf32>
    %104 = vector.broadcast %103 : vector<1x16xf32> to vector<16x16xf32>
    %105 = arith.addf %102, %104 : vector<16x16xf32>
    %106 = vector.shape_cast %105 : vector<16x16xf32> to vector<2x8x16xf32>
    %107 = arith.truncf %92 : vector<2x8x16xf32> to vector<2x8x16xbf16>
    %108 = arith.truncf %99 : vector<2x8x16xf32> to vector<2x8x16xbf16>
    "tpu.trace_start"() <{level = 10 : i32, message = "bqd,bkd->bqk"}> : () -> ()
    %cst_51 = arith.constant dense<0.000000e+00> : vector<2x8x8xf32>
    %109 = tpu.matmul %107, %108, %cst_51 {dimension_numbers = #tpu.dot_dimension_numbers<[2], [2], [1], [1], [0, 0, 0, 1, 1, 1], [0], [0]>} : vector<2x8x16xbf16>, vector<2x8x16xbf16>, vector<2x8x8xf32> -> vector<2x8x8xf32>
    "tpu.trace_stop"() : () -> ()
    %110 = arith.addf %109, %30 : vector<2x8x8xf32>
    %cst_52 = arith.constant dense<0xFF800000> : vector<2x8xf32>
    %111 = vector.multi_reduction <maximumf>, %110, %cst_52 [2] : vector<2x8x8xf32> to vector<2x8xf32>
    %112 = vector.shape_cast %111 : vector<2x8xf32> to vector<2x8x1xf32>
    %113 = vector.broadcast %112 : vector<2x8x1xf32> to vector<2x8x8xf32>
    %114 = arith.subf %110, %113 : vector<2x8x8xf32>
    %115 = math.exp %114 : vector<2x8x8xf32>
    %cst_53 = arith.constant dense<0.000000e+00> : vector<2x8xf32>
    %116 = vector.multi_reduction <add>, %115, %cst_53 [2] : vector<2x8x8xf32> to vector<2x8xf32>
    %117 = vector.shape_cast %116 : vector<2x8xf32> to vector<2x8x1xf32>
    %118 = vector.broadcast %117 : vector<2x8x1xf32> to vector<2x8x8xf32>
    %119 = arith.divf %115, %118 : vector<2x8x8xf32>
    %120 = arith.truncf %119 : vector<2x8x8xf32> to vector<2x8x8xbf16>
    %121 = arith.truncf %106 : vector<2x8x16xf32> to vector<2x8x16xbf16>
    "tpu.trace_start"() <{level = 10 : i32, message = "bqk,bkd->bqd"}> : () -> ()
    %cst_54 = arith.constant dense<0.000000e+00> : vector<2x8x16xf32>
    %122 = tpu.matmul %120, %121, %cst_54 {dimension_numbers = #tpu.dot_dimension_numbers<[2], [1], [1], [2], [0, 0, 0, 1, 1, 2], [0], [0]>} : vector<2x8x8xbf16>, vector<2x8x16xbf16>, vector<2x8x16xf32> -> vector<2x8x16xf32>
    "tpu.trace_stop"() : () -> ()
    %123 = vector.shape_cast %122 : vector<2x8x16xf32> to vector<16x16xf32>
    %124 = arith.truncf %123 : vector<16x16xf32> to vector<16x16xbf16>
    %c0_55 = arith.constant 0 : index
    %c1_56 = arith.constant 1 : index
    %c0_57 = arith.constant 0 : index
    %c0_58 = arith.constant 0 : index
    %125 = vector.load %arg4[%c0_55, %c1_56, %c0_57, %c0_58] : memref<1x4x16x32xbf16, #tpu.memory_space<vmem>>, vector<1x1x16x32xbf16>
    %126 = vector.shape_cast %125 : vector<1x1x16x32xbf16> to vector<16x32xbf16>
    %cst_59 = arith.constant dense<0.000000e+00> : vector<16x32xf32>
    %127 = tpu.matmul %124, %126, %cst_59 {dimension_numbers = #tpu.dot_dimension_numbers<[1], [0], [0], [1], [0, 0, 1, 1], [], []>} : vector<16x16xbf16>, vector<16x32xbf16>, vector<16x32xf32> -> vector<16x32xf32>
    %128 = arith.addf %85, %127 : vector<16x32xf32>
    %129 = vector.broadcast %34 : vector<1x32xf32> to vector<16x32xf32>
    %130 = arith.addf %128, %129 : vector<16x32xf32>
    %131 = arith.addf %130, %25 : vector<16x32xf32>
    %cst_60 = arith.constant dense<0.000000e+00> : vector<16xf32>
    %132 = vector.multi_reduction <add>, %131, %cst_60 [1] : vector<16x32xf32> to vector<16xf32>
    %133 = vector.shape_cast %132 : vector<16xf32> to vector<16x1xf32>
    %cst_61 = arith.constant 3.200000e+01 : f32
    %134 = vector.broadcast %cst_61 : f32 to vector<16x1xf32>
    %135 = arith.divf %133, %134 : vector<16x1xf32>
    %136 = vector.broadcast %135 : vector<16x1xf32> to vector<16x32xf32>
    %137 = arith.subf %131, %136 : vector<16x32xf32>
    %138 = arith.mulf %137, %137 : vector<16x32xf32>
    %cst_62 = arith.constant dense<0.000000e+00> : vector<16xf32>
    %139 = vector.multi_reduction <add>, %138, %cst_62 [1] : vector<16x32xf32> to vector<16xf32>
    %140 = vector.shape_cast %139 : vector<16xf32> to vector<16x1xf32>
    %cst_63 = arith.constant 3.200000e+01 : f32
    %141 = vector.broadcast %cst_63 : f32 to vector<16x1xf32>
    %142 = arith.divf %140, %141 : vector<16x1xf32>
    %cst_64 = arith.constant 9.99999996E-13 : f32
    %143 = vector.broadcast %cst_64 : f32 to vector<16x1xf32>
    %144 = arith.addf %142, %143 : vector<16x1xf32>
    %145 = math.rsqrt %144 : vector<16x1xf32>
    %146 = vector.broadcast %145 : vector<16x1xf32> to vector<16x32xf32>
    %147 = arith.mulf %137, %146 : vector<16x32xf32>
    %148 = vector.broadcast %35 : vector<1x32xf32> to vector<16x32xf32>
    %149 = arith.mulf %147, %148 : vector<16x32xf32>
    %150 = vector.broadcast %36 : vector<1x32xf32> to vector<16x32xf32>
    %151 = arith.addf %149, %150 : vector<16x32xf32>
    %152 = arith.truncf %151 : vector<16x32xf32> to vector<16x32xbf16>
    %c0_65 = arith.constant 0 : index
    %c0_66 = arith.constant 0 : index
    %c0_67 = arith.constant 0 : index
    %c0_68 = arith.constant 0 : index
    %153 = vector.load %arg5[%c0_65, %c0_66, %c0_67, %c0_68] : memref<1x2x32x64xbf16, #tpu.memory_space<vmem>>, vector<1x1x32x64xbf16>
    %154 = vector.shape_cast %153 : vector<1x1x32x64xbf16> to vector<32x64xbf16>
    %cst_69 = arith.constant dense<0.000000e+00> : vector<16x64xf32>
    %155 = tpu.matmul %152, %154, %cst_69 {dimension_numbers = #tpu.dot_dimension_numbers<[1], [0], [0], [1], [0, 0, 1, 1], [], []>} : vector<16x32xbf16>, vector<32x64xbf16>, vector<16x64xf32> -> vector<16x64xf32>
    %156 = vector.broadcast %37 : vector<1x64xf32> to vector<16x64xf32>
    %157 = arith.addf %155, %156 : vector<16x64xf32>
    %cst_70 = arith.constant 5.000000e-01 : f32
    %158 = vector.broadcast %cst_70 : f32 to vector<16x64xf32>
    %159 = arith.mulf %158, %157 : vector<16x64xf32>
    %cst_71 = arith.constant 4.471500e-02 : f32
    %160 = vector.broadcast %cst_71 : f32 to vector<16x64xf32>
    %161 = arith.mulf %160, %157 : vector<16x64xf32>
    %162 = arith.mulf %161, %157 : vector<16x64xf32>
    %163 = arith.mulf %162, %157 : vector<16x64xf32>
    %164 = arith.addf %157, %163 : vector<16x64xf32>
    %cst_72 = arith.constant 0.797884583 : f32
    %165 = vector.broadcast %cst_72 : f32 to vector<16x64xf32>
    %166 = arith.mulf %165, %164 : vector<16x64xf32>
    %167 = math.tanh %166 : vector<16x64xf32>
    %cst_73 = arith.constant 1.000000e+00 : f32
    %168 = vector.broadcast %cst_73 : f32 to vector<16x64xf32>
    %169 = arith.addf %168, %167 : vector<16x64xf32>
    %170 = arith.mulf %159, %169 : vector<16x64xf32>
    %171 = arith.truncf %170 : vector<16x64xf32> to vector<16x64xbf16>
    %c0_74 = arith.constant 0 : index
    %c0_75 = arith.constant 0 : index
    %c0_76 = arith.constant 0 : index
    %c0_77 = arith.constant 0 : index
    %172 = vector.load %arg6[%c0_74, %c0_75, %c0_76, %c0_77] : memref<1x2x64x32xbf16, #tpu.memory_space<vmem>>, vector<1x1x64x32xbf16>
    %173 = vector.shape_cast %172 : vector<1x1x64x32xbf16> to vector<64x32xbf16>
    %cst_78 = arith.constant dense<0.000000e+00> : vector<16x32xf32>
    %174 = tpu.matmul %171, %173, %cst_78 {dimension_numbers = #tpu.dot_dimension_numbers<[1], [0], [0], [1], [0, 0, 1, 1], [], []>} : vector<16x64xbf16>, vector<64x32xbf16>, vector<16x32xf32> -> vector<16x32xf32>
    %175 = vector.broadcast %38 : vector<1x32xf32> to vector<16x32xf32>
    %176 = arith.addf %174, %175 : vector<16x32xf32>
    %177 = arith.addf %176, %151 : vector<16x32xf32>
    %cst_79 = arith.constant dense<0.000000e+00> : vector<16xf32>
    %178 = vector.multi_reduction <add>, %177, %cst_79 [1] : vector<16x32xf32> to vector<16xf32>
    %179 = vector.shape_cast %178 : vector<16xf32> to vector<16x1xf32>
    %cst_80 = arith.constant 3.200000e+01 : f32
    %180 = vector.broadcast %cst_80 : f32 to vector<16x1xf32>
    %181 = arith.divf %179, %180 : vector<16x1xf32>
    %182 = vector.broadcast %181 : vector<16x1xf32> to vector<16x32xf32>
    %183 = arith.subf %177, %182 : vector<16x32xf32>
    %184 = arith.mulf %183, %183 : vector<16x32xf32>
    %cst_81 = arith.constant dense<0.000000e+00> : vector<16xf32>
    %185 = vector.multi_reduction <add>, %184, %cst_81 [1] : vector<16x32xf32> to vector<16xf32>
    %186 = vector.shape_cast %185 : vector<16xf32> to vector<16x1xf32>
    %cst_82 = arith.constant 3.200000e+01 : f32
    %187 = vector.broadcast %cst_82 : f32 to vector<16x1xf32>
    %188 = arith.divf %186, %187 : vector<16x1xf32>
    %cst_83 = arith.constant 9.99999996E-13 : f32
    %189 = vector.broadcast %cst_83 : f32 to vector<16x1xf32>
    %190 = arith.addf %188, %189 : vector<16x1xf32>
    %191 = math.rsqrt %190 : vector<16x1xf32>
    %192 = vector.broadcast %191 : vector<16x1xf32> to vector<16x32xf32>
    %193 = arith.mulf %183, %192 : vector<16x32xf32>
    %194 = vector.broadcast %39 : vector<1x32xf32> to vector<16x32xf32>
    %195 = arith.mulf %193, %194 : vector<16x32xf32>
    %196 = vector.broadcast %40 : vector<1x32xf32> to vector<16x32xf32>
    %197 = arith.addf %195, %196 : vector<16x32xf32>
    %c0_84 = arith.constant 0 : index
    %c1_85 = arith.constant 1 : index
    %c0_86 = arith.constant 0 : index
    %c0_87 = arith.constant 0 : index
    %198 = vector.load %arg7[%c0_84, %c1_85, %c0_86, %c0_87] : memref<1x2x8x96xf32, #tpu.memory_space<vmem>>, vector<1x1x8x96xf32>
    %199 = vector.shape_cast %198 : vector<1x1x8x96xf32> to vector<8x96xf32>
    %200 = vector.extract_strided_slice %199 {offsets = [0, 0], sizes = [1, 96], strides = [1, 1]} : vector<8x96xf32> to vector<1x96xf32>
    %201 = vector.extract_strided_slice %199 {offsets = [1, 0], sizes = [1, 32], strides = [1, 1]} : vector<8x96xf32> to vector<1x32xf32>
    %202 = vector.extract_strided_slice %199 {offsets = [2, 0], sizes = [1, 32], strides = [1, 1]} : vector<8x96xf32> to vector<1x32xf32>
    %203 = vector.extract_strided_slice %199 {offsets = [3, 0], sizes = [1, 32], strides = [1, 1]} : vector<8x96xf32> to vector<1x32xf32>
    %204 = vector.extract_strided_slice %199 {offsets = [4, 0], sizes = [1, 64], strides = [1, 1]} : vector<8x96xf32> to vector<1x64xf32>
    %205 = vector.extract_strided_slice %199 {offsets = [5, 0], sizes = [1, 32], strides = [1, 1]} : vector<8x96xf32> to vector<1x32xf32>
    %206 = vector.extract_strided_slice %199 {offsets = [6, 0], sizes = [1, 32], strides = [1, 1]} : vector<8x96xf32> to vector<1x32xf32>
    %207 = vector.extract_strided_slice %199 {offsets = [7, 0], sizes = [1, 32], strides = [1, 1]} : vector<8x96xf32> to vector<1x32xf32>
    %208 = arith.truncf %197 : vector<16x32xf32> to vector<16x32xbf16>
    %cst_88 = arith.constant 0.000000e+00 : f32
    %209 = vector.broadcast %cst_88 : f32 to vector<16x32xf32>
    %c0_89 = arith.constant 0 : index
    %c6 = arith.constant 6 : index
    %c0_90 = arith.constant 0 : index
    %c0_91 = arith.constant 0 : index
    %210 = vector.load %arg3[%c0_89, %c6, %c0_90, %c0_91] : memref<1x12x32x16xbf16, #tpu.memory_space<vmem>>, vector<1x1x32x16xbf16>
    %211 = vector.shape_cast %210 : vector<1x1x32x16xbf16> to vector<32x16xbf16>
    %cst_92 = arith.constant dense<0.000000e+00> : vector<16x16xf32>
    %212 = tpu.matmul %208, %211, %cst_92 {dimension_numbers = #tpu.dot_dimension_numbers<[1], [0], [0], [1], [0, 0, 1, 1], [], []>} : vector<16x32xbf16>, vector<32x16xbf16>, vector<16x16xf32> -> vector<16x16xf32>
    %213 = vector.extract_strided_slice %200 {offsets = [0, 0], sizes = [1, 16], strides = [1, 1]} : vector<1x96xf32> to vector<1x16xf32>
    %214 = vector.broadcast %213 : vector<1x16xf32> to vector<16x16xf32>
    %215 = arith.addf %212, %214 : vector<16x16xf32>
    %216 = vector.shape_cast %215 : vector<16x16xf32> to vector<2x8x16xf32>
    %c0_93 = arith.constant 0 : index
    %c7 = arith.constant 7 : index
    %c0_94 = arith.constant 0 : index
    %c0_95 = arith.constant 0 : index
    %217 = vector.load %arg3[%c0_93, %c7, %c0_94, %c0_95] : memref<1x12x32x16xbf16, #tpu.memory_space<vmem>>, vector<1x1x32x16xbf16>
    %218 = vector.shape_cast %217 : vector<1x1x32x16xbf16> to vector<32x16xbf16>
    %cst_96 = arith.constant dense<0.000000e+00> : vector<16x16xf32>
    %219 = tpu.matmul %208, %218, %cst_96 {dimension_numbers = #tpu.dot_dimension_numbers<[1], [0], [0], [1], [0, 0, 1, 1], [], []>} : vector<16x32xbf16>, vector<32x16xbf16>, vector<16x16xf32> -> vector<16x16xf32>
    %220 = vector.extract_strided_slice %200 {offsets = [0, 32], sizes = [1, 16], strides = [1, 1]} : vector<1x96xf32> to vector<1x16xf32>
    %221 = vector.broadcast %220 : vector<1x16xf32> to vector<16x16xf32>
    %222 = arith.addf %219, %221 : vector<16x16xf32>
    %223 = vector.shape_cast %222 : vector<16x16xf32> to vector<2x8x16xf32>
    %c0_97 = arith.constant 0 : index
    %c8 = arith.constant 8 : index
    %c0_98 = arith.constant 0 : index
    %c0_99 = arith.constant 0 : index
    %224 = vector.load %arg3[%c0_97, %c8, %c0_98, %c0_99] : memref<1x12x32x16xbf16, #tpu.memory_space<vmem>>, vector<1x1x32x16xbf16>
    %225 = vector.shape_cast %224 : vector<1x1x32x16xbf16> to vector<32x16xbf16>
    %cst_100 = arith.constant dense<0.000000e+00> : vector<16x16xf32>
    %226 = tpu.matmul %208, %225, %cst_100 {dimension_numbers = #tpu.dot_dimension_numbers<[1], [0], [0], [1], [0, 0, 1, 1], [], []>} : vector<16x32xbf16>, vector<32x16xbf16>, vector<16x16xf32> -> vector<16x16xf32>
    %227 = vector.extract_strided_slice %200 {offsets = [0, 64], sizes = [1, 16], strides = [1, 1]} : vector<1x96xf32> to vector<1x16xf32>
    %228 = vector.broadcast %227 : vector<1x16xf32> to vector<16x16xf32>
    %229 = arith.addf %226, %228 : vector<16x16xf32>
    %230 = vector.shape_cast %229 : vector<16x16xf32> to vector<2x8x16xf32>
    %231 = arith.truncf %216 : vector<2x8x16xf32> to vector<2x8x16xbf16>
    %232 = arith.truncf %223 : vector<2x8x16xf32> to vector<2x8x16xbf16>
    "tpu.trace_start"() <{level = 10 : i32, message = "bqd,bkd->bqk"}> : () -> ()
    %cst_101 = arith.constant dense<0.000000e+00> : vector<2x8x8xf32>
    %233 = tpu.matmul %231, %232, %cst_101 {dimension_numbers = #tpu.dot_dimension_numbers<[2], [2], [1], [1], [0, 0, 0, 1, 1, 1], [0], [0]>} : vector<2x8x16xbf16>, vector<2x8x16xbf16>, vector<2x8x8xf32> -> vector<2x8x8xf32>
    "tpu.trace_stop"() : () -> ()
    %234 = arith.addf %233, %30 : vector<2x8x8xf32>
    %cst_102 = arith.constant dense<0xFF800000> : vector<2x8xf32>
    %235 = vector.multi_reduction <maximumf>, %234, %cst_102 [2] : vector<2x8x8xf32> to vector<2x8xf32>
    %236 = vector.shape_cast %235 : vector<2x8xf32> to vector<2x8x1xf32>
    %237 = vector.broadcast %236 : vector<2x8x1xf32> to vector<2x8x8xf32>
    %238 = arith.subf %234, %237 : vector<2x8x8xf32>
    %239 = math.exp %238 : vector<2x8x8xf32>
    %cst_103 = arith.constant dense<0.000000e+00> : vector<2x8xf32>
    %240 = vector.multi_reduction <add>, %239, %cst_103 [2] : vector<2x8x8xf32> to vector<2x8xf32>
    %241 = vector.shape_cast %240 : vector<2x8xf32> to vector<2x8x1xf32>
    %242 = vector.broadcast %241 : vector<2x8x1xf32> to vector<2x8x8xf32>
    %243 = arith.divf %239, %242 : vector<2x8x8xf32>
    %244 = arith.truncf %243 : vector<2x8x8xf32> to vector<2x8x8xbf16>
    %245 = arith.truncf %230 : vector<2x8x16xf32> to vector<2x8x16xbf16>
    "tpu.trace_start"() <{level = 10 : i32, message = "bqk,bkd->bqd"}> : () -> ()
    %cst_104 = arith.constant dense<0.000000e+00> : vector<2x8x16xf32>
    %246 = tpu.matmul %244, %245, %cst_104 {dimension_numbers = #tpu.dot_dimension_numbers<[2], [1], [1], [2], [0, 0, 0, 1, 1, 2], [0], [0]>} : vector<2x8x8xbf16>, vector<2x8x16xbf16>, vector<2x8x16xf32> -> vector<2x8x16xf32>
    "tpu.trace_stop"() : () -> ()
    %247 = vector.shape_cast %246 : vector<2x8x16xf32> to vector<16x16xf32>
    %248 = arith.truncf %247 : vector<16x16xf32> to vector<16x16xbf16>
    %c0_105 = arith.constant 0 : index
    %c2_106 = arith.constant 2 : index
    %c0_107 = arith.constant 0 : index
    %c0_108 = arith.constant 0 : index
    %249 = vector.load %arg4[%c0_105, %c2_106, %c0_107, %c0_108] : memref<1x4x16x32xbf16, #tpu.memory_space<vmem>>, vector<1x1x16x32xbf16>
    %250 = vector.shape_cast %249 : vector<1x1x16x32xbf16> to vector<16x32xbf16>
    %cst_109 = arith.constant dense<0.000000e+00> : vector<16x32xf32>
    %251 = tpu.matmul %248, %250, %cst_109 {dimension_numbers = #tpu.dot_dimension_numbers<[1], [0], [0], [1], [0, 0, 1, 1], [], []>} : vector<16x16xbf16>, vector<16x32xbf16>, vector<16x32xf32> -> vector<16x32xf32>
    %252 = arith.addf %209, %251 : vector<16x32xf32>
    %c0_110 = arith.constant 0 : index
    %c9 = arith.constant 9 : index
    %c0_111 = arith.constant 0 : index
    %c0_112 = arith.constant 0 : index
    %253 = vector.load %arg3[%c0_110, %c9, %c0_111, %c0_112] : memref<1x12x32x16xbf16, #tpu.memory_space<vmem>>, vector<1x1x32x16xbf16>
    %254 = vector.shape_cast %253 : vector<1x1x32x16xbf16> to vector<32x16xbf16>
    %cst_113 = arith.constant dense<0.000000e+00> : vector<16x16xf32>
    %255 = tpu.matmul %208, %254, %cst_113 {dimension_numbers = #tpu.dot_dimension_numbers<[1], [0], [0], [1], [0, 0, 1, 1], [], []>} : vector<16x32xbf16>, vector<32x16xbf16>, vector<16x16xf32> -> vector<16x16xf32>
    %256 = vector.extract_strided_slice %200 {offsets = [0, 16], sizes = [1, 16], strides = [1, 1]} : vector<1x96xf32> to vector<1x16xf32>
    %257 = vector.broadcast %256 : vector<1x16xf32> to vector<16x16xf32>
    %258 = arith.addf %255, %257 : vector<16x16xf32>
    %259 = vector.shape_cast %258 : vector<16x16xf32> to vector<2x8x16xf32>
    %c0_114 = arith.constant 0 : index
    %c10 = arith.constant 10 : index
    %c0_115 = arith.constant 0 : index
    %c0_116 = arith.constant 0 : index
    %260 = vector.load %arg3[%c0_114, %c10, %c0_115, %c0_116] : memref<1x12x32x16xbf16, #tpu.memory_space<vmem>>, vector<1x1x32x16xbf16>
    %261 = vector.shape_cast %260 : vector<1x1x32x16xbf16> to vector<32x16xbf16>
    %cst_117 = arith.constant dense<0.000000e+00> : vector<16x16xf32>
    %262 = tpu.matmul %208, %261, %cst_117 {dimension_numbers = #tpu.dot_dimension_numbers<[1], [0], [0], [1], [0, 0, 1, 1], [], []>} : vector<16x32xbf16>, vector<32x16xbf16>, vector<16x16xf32> -> vector<16x16xf32>
    %263 = vector.extract_strided_slice %200 {offsets = [0, 48], sizes = [1, 16], strides = [1, 1]} : vector<1x96xf32> to vector<1x16xf32>
    %264 = vector.broadcast %263 : vector<1x16xf32> to vector<16x16xf32>
    %265 = arith.addf %262, %264 : vector<16x16xf32>
    %266 = vector.shape_cast %265 : vector<16x16xf32> to vector<2x8x16xf32>
    %c0_118 = arith.constant 0 : index
    %c11 = arith.constant 11 : index
    %c0_119 = arith.constant 0 : index
    %c0_120 = arith.constant 0 : index
    %267 = vector.load %arg3[%c0_118, %c11, %c0_119, %c0_120] : memref<1x12x32x16xbf16, #tpu.memory_space<vmem>>, vector<1x1x32x16xbf16>
    %268 = vector.shape_cast %267 : vector<1x1x32x16xbf16> to vector<32x16xbf16>
    %cst_121 = arith.constant dense<0.000000e+00> : vector<16x16xf32>
    %269 = tpu.matmul %208, %268, %cst_121 {dimension_numbers = #tpu.dot_dimension_numbers<[1], [0], [0], [1], [0, 0, 1, 1], [], []>} : vector<16x32xbf16>, vector<32x16xbf16>, vector<16x16xf32> -> vector<16x16xf32>
    %270 = vector.extract_strided_slice %200 {offsets = [0, 80], sizes = [1, 16], strides = [1, 1]} : vector<1x96xf32> to vector<1x16xf32>
    %271 = vector.broadcast %270 : vector<1x16xf32> to vector<16x16xf32>
    %272 = arith.addf %269, %271 : vector<16x16xf32>
    %273 = vector.shape_cast %272 : vector<16x16xf32> to vector<2x8x16xf32>
    %274 = arith.truncf %259 : vector<2x8x16xf32> to vector<2x8x16xbf16>
    %275 = arith.truncf %266 : vector<2x8x16xf32> to vector<2x8x16xbf16>
    "tpu.trace_start"() <{level = 10 : i32, message = "bqd,bkd->bqk"}> : () -> ()
    %cst_122 = arith.constant dense<0.000000e+00> : vector<2x8x8xf32>
    %276 = tpu.matmul %274, %275, %cst_122 {dimension_numbers = #tpu.dot_dimension_numbers<[2], [2], [1], [1], [0, 0, 0, 1, 1, 1], [0], [0]>} : vector<2x8x16xbf16>, vector<2x8x16xbf16>, vector<2x8x8xf32> -> vector<2x8x8xf32>
    "tpu.trace_stop"() : () -> ()
    %277 = arith.addf %276, %30 : vector<2x8x8xf32>
    %cst_123 = arith.constant dense<0xFF800000> : vector<2x8xf32>
    %278 = vector.multi_reduction <maximumf>, %277, %cst_123 [2] : vector<2x8x8xf32> to vector<2x8xf32>
    %279 = vector.shape_cast %278 : vector<2x8xf32> to vector<2x8x1xf32>
    %280 = vector.broadcast %279 : vector<2x8x1xf32> to vector<2x8x8xf32>
    %281 = arith.subf %277, %280 : vector<2x8x8xf32>
    %282 = math.exp %281 : vector<2x8x8xf32>
    %cst_124 = arith.constant dense<0.000000e+00> : vector<2x8xf32>
    %283 = vector.multi_reduction <add>, %282, %cst_124 [2] : vector<2x8x8xf32> to vector<2x8xf32>
    %284 = vector.shape_cast %283 : vector<2x8xf32> to vector<2x8x1xf32>
    %285 = vector.broadcast %284 : vector<2x8x1xf32> to vector<2x8x8xf32>
    %286 = arith.divf %282, %285 : vector<2x8x8xf32>
    %287 = arith.truncf %286 : vector<2x8x8xf32> to vector<2x8x8xbf16>
    %288 = arith.truncf %273 : vector<2x8x16xf32> to vector<2x8x16xbf16>
    "tpu.trace_start"() <{level = 10 : i32, message = "bqk,bkd->bqd"}> : () -> ()
    %cst_125 = arith.constant dense<0.000000e+00> : vector<2x8x16xf32>
    %289 = tpu.matmul %287, %288, %cst_125 {dimension_numbers = #tpu.dot_dimension_numbers<[2], [1], [1], [2], [0, 0, 0, 1, 1, 2], [0], [0]>} : vector<2x8x8xbf16>, vector<2x8x16xbf16>, vector<2x8x16xf32> -> vector<2x8x16xf32>
    "tpu.trace_stop"() : () -> ()
    %290 = vector.shape_cast %289 : vector<2x8x16xf32> to vector<16x16xf32>
    %291 = arith.truncf %290 : vector<16x16xf32> to vector<16x16xbf16>
    %c0_126 = arith.constant 0 : index
    %c3_127 = arith.constant 3 : index
    %c0_128 = arith.constant 0 : index
    %c0_129 = arith.constant 0 : index
    %292 = vector.load %arg4[%c0_126, %c3_127, %c0_128, %c0_129] : memref<1x4x16x32xbf16, #tpu.memory_space<vmem>>, vector<1x1x16x32xbf16>
    %293 = vector.shape_cast %292 : vector<1x1x16x32xbf16> to vector<16x32xbf16>
    %cst_130 = arith.constant dense<0.000000e+00> : vector<16x32xf32>
    %294 = tpu.matmul %291, %293, %cst_130 {dimension_numbers = #tpu.dot_dimension_numbers<[1], [0], [0], [1], [0, 0, 1, 1], [], []>} : vector<16x16xbf16>, vector<16x32xbf16>, vector<16x32xf32> -> vector<16x32xf32>
    %295 = arith.addf %252, %294 : vector<16x32xf32>
    %296 = vector.broadcast %201 : vector<1x32xf32> to vector<16x32xf32>
    %297 = arith.addf %295, %296 : vector<16x32xf32>
    %298 = arith.addf %297, %197 : vector<16x32xf32>
    %cst_131 = arith.constant dense<0.000000e+00> : vector<16xf32>
    %299 = vector.multi_reduction <add>, %298, %cst_131 [1] : vector<16x32xf32> to vector<16xf32>
    %300 = vector.shape_cast %299 : vector<16xf32> to vector<16x1xf32>
    %cst_132 = arith.constant 3.200000e+01 : f32
    %301 = vector.broadcast %cst_132 : f32 to vector<16x1xf32>
    %302 = arith.divf %300, %301 : vector<16x1xf32>
    %303 = vector.broadcast %302 : vector<16x1xf32> to vector<16x32xf32>
    %304 = arith.subf %298, %303 : vector<16x32xf32>
    %305 = arith.mulf %304, %304 : vector<16x32xf32>
    %cst_133 = arith.constant dense<0.000000e+00> : vector<16xf32>
    %306 = vector.multi_reduction <add>, %305, %cst_133 [1] : vector<16x32xf32> to vector<16xf32>
    %307 = vector.shape_cast %306 : vector<16xf32> to vector<16x1xf32>
    %cst_134 = arith.constant 3.200000e+01 : f32
    %308 = vector.broadcast %cst_134 : f32 to vector<16x1xf32>
    %309 = arith.divf %307, %308 : vector<16x1xf32>
    %cst_135 = arith.constant 9.99999996E-13 : f32
    %310 = vector.broadcast %cst_135 : f32 to vector<16x1xf32>
    %311 = arith.addf %309, %310 : vector<16x1xf32>
    %312 = math.rsqrt %311 : vector<16x1xf32>
    %313 = vector.broadcast %312 : vector<16x1xf32> to vector<16x32xf32>
    %314 = arith.mulf %304, %313 : vector<16x32xf32>
    %315 = vector.broadcast %202 : vector<1x32xf32> to vector<16x32xf32>
    %316 = arith.mulf %314, %315 : vector<16x32xf32>
    %317 = vector.broadcast %203 : vector<1x32xf32> to vector<16x32xf32>
    %318 = arith.addf %316, %317 : vector<16x32xf32>
    %319 = arith.truncf %318 : vector<16x32xf32> to vector<16x32xbf16>
    %c0_136 = arith.constant 0 : index
    %c1_137 = arith.constant 1 : index
    %c0_138 = arith.constant 0 : index
    %c0_139 = arith.constant 0 : index
    %320 = vector.load %arg5[%c0_136, %c1_137, %c0_138, %c0_139] : memref<1x2x32x64xbf16, #tpu.memory_space<vmem>>, vector<1x1x32x64xbf16>
    %321 = vector.shape_cast %320 : vector<1x1x32x64xbf16> to vector<32x64xbf16>
    %cst_140 = arith.constant dense<0.000000e+00> : vector<16x64xf32>
    %322 = tpu.matmul %319, %321, %cst_140 {dimension_numbers = #tpu.dot_dimension_numbers<[1], [0], [0], [1], [0, 0, 1, 1], [], []>} : vector<16x32xbf16>, vector<32x64xbf16>, vector<16x64xf32> -> vector<16x64xf32>
    %323 = vector.broadcast %204 : vector<1x64xf32> to vector<16x64xf32>
    %324 = arith.addf %322, %323 : vector<16x64xf32>
    %cst_141 = arith.constant 5.000000e-01 : f32
    %325 = vector.broadcast %cst_141 : f32 to vector<16x64xf32>
    %326 = arith.mulf %325, %324 : vector<16x64xf32>
    %cst_142 = arith.constant 4.471500e-02 : f32
    %327 = vector.broadcast %cst_142 : f32 to vector<16x64xf32>
    %328 = arith.mulf %327, %324 : vector<16x64xf32>
    %329 = arith.mulf %328, %324 : vector<16x64xf32>
    %330 = arith.mulf %329, %324 : vector<16x64xf32>
    %331 = arith.addf %324, %330 : vector<16x64xf32>
    %cst_143 = arith.constant 0.797884583 : f32
    %332 = vector.broadcast %cst_143 : f32 to vector<16x64xf32>
    %333 = arith.mulf %332, %331 : vector<16x64xf32>
    %334 = math.tanh %333 : vector<16x64xf32>
    %cst_144 = arith.constant 1.000000e+00 : f32
    %335 = vector.broadcast %cst_144 : f32 to vector<16x64xf32>
    %336 = arith.addf %335, %334 : vector<16x64xf32>
    %337 = arith.mulf %326, %336 : vector<16x64xf32>
    %338 = arith.truncf %337 : vector<16x64xf32> to vector<16x64xbf16>
    %c0_145 = arith.constant 0 : index
    %c1_146 = arith.constant 1 : index
    %c0_147 = arith.constant 0 : index
    %c0_148 = arith.constant 0 : index
    %339 = vector.load %arg6[%c0_145, %c1_146, %c0_147, %c0_148] : memref<1x2x64x32xbf16, #tpu.memory_space<vmem>>, vector<1x1x64x32xbf16>
    %340 = vector.shape_cast %339 : vector<1x1x64x32xbf16> to vector<64x32xbf16>
    %cst_149 = arith.constant dense<0.000000e+00> : vector<16x32xf32>
    %341 = tpu.matmul %338, %340, %cst_149 {dimension_numbers = #tpu.dot_dimension_numbers<[1], [0], [0], [1], [0, 0, 1, 1], [], []>} : vector<16x64xbf16>, vector<64x32xbf16>, vector<16x32xf32> -> vector<16x32xf32>
    %342 = vector.broadcast %205 : vector<1x32xf32> to vector<16x32xf32>
    %343 = arith.addf %341, %342 : vector<16x32xf32>
    %344 = arith.addf %343, %318 : vector<16x32xf32>
    %cst_150 = arith.constant dense<0.000000e+00> : vector<16xf32>
    %345 = vector.multi_reduction <add>, %344, %cst_150 [1] : vector<16x32xf32> to vector<16xf32>
    %346 = vector.shape_cast %345 : vector<16xf32> to vector<16x1xf32>
    %cst_151 = arith.constant 3.200000e+01 : f32
    %347 = vector.broadcast %cst_151 : f32 to vector<16x1xf32>
    %348 = arith.divf %346, %347 : vector<16x1xf32>
    %349 = vector.broadcast %348 : vector<16x1xf32> to vector<16x32xf32>
    %350 = arith.subf %344, %349 : vector<16x32xf32>
    %351 = arith.mulf %350, %350 : vector<16x32xf32>
    %cst_152 = arith.constant dense<0.000000e+00> : vector<16xf32>
    %352 = vector.multi_reduction <add>, %351, %cst_152 [1] : vector<16x32xf32> to vector<16xf32>
    %353 = vector.shape_cast %352 : vector<16xf32> to vector<16x1xf32>
    %cst_153 = arith.constant 3.200000e+01 : f32
    %354 = vector.broadcast %cst_153 : f32 to vector<16x1xf32>
    %355 = arith.divf %353, %354 : vector<16x1xf32>
    %cst_154 = arith.constant 9.99999996E-13 : f32
    %356 = vector.broadcast %cst_154 : f32 to vector<16x1xf32>
    %357 = arith.addf %355, %356 : vector<16x1xf32>
    %358 = math.rsqrt %357 : vector<16x1xf32>
    %359 = vector.broadcast %358 : vector<16x1xf32> to vector<16x32xf32>
    %360 = arith.mulf %350, %359 : vector<16x32xf32>
    %361 = vector.broadcast %206 : vector<1x32xf32> to vector<16x32xf32>
    %362 = arith.mulf %360, %361 : vector<16x32xf32>
    %363 = vector.broadcast %207 : vector<1x32xf32> to vector<16x32xf32>
    %364 = arith.addf %362, %363 : vector<16x32xf32>
    %365 = vector.extract_strided_slice %364 {offsets = [0, 0], sizes = [1, 32], strides = [1, 1]} : vector<16x32xf32> to vector<1x32xf32>
    %366 = vector.extract_strided_slice %364 {offsets = [8, 0], sizes = [1, 32], strides = [1, 1]} : vector<16x32xf32> to vector<1x32xf32>
    %367 = tpu.concatenate %365, %366 in 0 : vector<1x32xf32>, vector<1x32xf32> -> vector<2x32xf32>
    %368 = vector.extract_strided_slice %1 {offsets = [3, 0], sizes = [32, 32], strides = [1, 1]} : vector<35x32xf32> to vector<32x32xf32>
    %cst_155 = arith.constant dense<0.000000e+00> : vector<2x32xf32>
    %369 = tpu.matmul %367, %368, %cst_155 {dimension_numbers = #tpu.dot_dimension_numbers<[1], [0], [0], [1], [0, 0, 1, 1], [], []>} : vector<2x32xf32>, vector<32x32xf32>, vector<2x32xf32> -> vector<2x32xf32>
    %370 = vector.extract_strided_slice %1 {offsets = [2, 0], sizes = [1, 32], strides = [1, 1]} : vector<35x32xf32> to vector<1x32xf32>
    %371 = vector.broadcast %370 : vector<1x32xf32> to vector<2x32xf32>
    %372 = arith.addf %369, %371 : vector<2x32xf32>
    %373 = math.tanh %372 : vector<2x32xf32>
    %c0_156 = arith.constant 0 : index
    %c0_157 = arith.constant 0 : index
    %c0_158 = arith.constant 0 : index
    %374 = vector.load %arg9[%c0_156, %c0_157, %c0_158] : memref<1x2x32xf32, #tpu.memory_space<vmem>>, vector<1x2x32xf32>
    %375 = vector.shape_cast %374 : vector<1x2x32xf32> to vector<2x32xf32>
    %376 = vector.shape_cast %373 : vector<2x32xf32> to vector<1x2x32xf32>
    tpu.vector_store %arg9[%c0_156, %c0_157, %c0_158], %376 {strides = array<i32>} : memref<1x2x32xf32, #tpu.memory_space<vmem>>, vector<1x2x32xf32>,
    return
  }
  func.func @transform_0(%arg0: i32) -> (i32, i32, i32) {
    %c0_i32 = arith.constant 0 : i32
    %c0_i32_0 = arith.constant 0 : i32
    %c0_i32_1 = arith.constant 0 : i32
    return %arg0, %c0_i32, %c0_i32_0 : i32, i32, i32
  }
  func.func @transform_1(%arg0: i32) -> (i32, i32, i32) {
    %c0_i32 = arith.constant 0 : i32
    %c0_i32_0 = arith.constant 0 : i32
    %c0_i32_1 = arith.constant 0 : i32
    return %arg0, %c0_i32, %c0_i32_0 : i32, i32, i32
  }
  func.func @transform_2(%arg0: i32) -> (i32, i32, i32, i32) {
    %c0_i32 = arith.constant 0 : i32
    %c0_i32_0 = arith.constant 0 : i32
    %c0_i32_1 = arith.constant 0 : i32
    %c0_i32_2 = arith.constant 0 : i32
    return %arg0, %c0_i32, %c0_i32_0, %c0_i32_1 : i32, i32, i32, i32
  }
  func.func @transform_3(%arg0: i32) -> (i32, i32, i32, i32) {
    %c0_i32 = arith.constant 0 : i32
    %c0_i32_0 = arith.constant 0 : i32
    %c0_i32_1 = arith.constant 0 : i32
    %c0_i32_2 = arith.constant 0 : i32
    return %arg0, %c0_i32, %c0_i32_0, %c0_i32_1 : i32, i32, i32, i32
  }
  func.func @transform_4(%arg0: i32) -> (i32, i32, i32, i32) {
    %c0_i32 = arith.constant 0 : i32
    %c0_i32_0 = arith.constant 0 : i32
    %c0_i32_1 = arith.constant 0 : i32
    %c0_i32_2 = arith.constant 0 : i32
    return %arg0, %c0_i32, %c0_i32_0, %c0_i32_1 : i32, i32, i32, i32
  }
  func.func @transform_5(%arg0: i32) -> (i32, i32, i32, i32) {
    %c0_i32 = arith.constant 0 : i32
    %c0_i32_0 = arith.constant 0 : i32
    %c0_i32_1 = arith.constant 0 : i32
    %c0_i32_2 = arith.constant 0 : i32
    return %arg0, %c0_i32, %c0_i32_0, %c0_i32_1 : i32, i32, i32, i32
  }
  func.func @transform_6(%arg0: i32) -> (i32, i32, i32, i32) {
    %c0_i32 = arith.constant 0 : i32
    %c0_i32_0 = arith.constant 0 : i32
    %c0_i32_1 = arith.constant 0 : i32
    %c0_i32_2 = arith.constant 0 : i32
    return %arg0, %c0_i32, %c0_i32_0, %c0_i32_1 : i32, i32, i32, i32
  }
  func.func @transform_7(%arg0: i32) -> (i32, i32, i32) {
    %c0_i32 = arith.constant 0 : i32
    %c0_i32_0 = arith.constant 0 : i32
    %c0_i32_1 = arith.constant 0 : i32
    return %arg0, %c0_i32, %c0_i32_0 : i32, i32, i32
  }
  func.func @transform_8(%arg0: i32) -> (i32, i32, i32) {
    %c0_i32 = arith.constant 0 : i32
    %c0_i32_0 = arith.constant 0 : i32
    %c0_i32_1 = arith.constant 0 : i32
    return %arg0, %c0_i32, %c0_i32_0 : i32, i32, i32
  }
}

</mosaic_0001>

<bundles_post_ra>
// kernel: multimodal_bert_forward.1
= control target key start
LH: loop header
LB: loop body
LE: loop exit
PB: predicated region body
PF: predicated region fallthrough
CT: control target
= control target key end

     0   :  { %s3808_s27 = smov 0   ;;  %s4315_s0 = inlined_call_operand.vmem [shape: f32[2,16,32], index: 0, kind: input, shape index: {}]   ;;  %s4316_s1 = inlined_call_operand.vmem [shape: f32[2,2,8], index: 1, kind: input, shape index: {}]   ;;  %s4317_s2 = inlined_call_operand.vmem [shape: bf16[2,12,32,16], index: 2, kind: input, shape index: {}]   ;;  %s4318_s3 = inlined_call_operand.vmem [shape: bf16[2,4,16,32], index: 3, kind: input, shape index: {}]   ;;  %s4319_s4 = inlined_call_operand.vmem [shape: bf16[2,2,32,64], index: 4, kind: input, shape index: {}]   ;;  %s4320_s5 = inlined_call_operand.vmem [shape: bf16[2,2,64,32], index: 5, kind: input, shape index: {}]   ;;  %s4321_s6 = inlined_call_operand.vmem [shape: f32[2,2,8,96], index: 6, kind: input, shape index: {}]   ;;  %s4322_s7 = inlined_call_operand.vmem [shape: f32[2,35,32], index: 7, kind: input, shape index: {}]   ;;  %s4323_s8 = inlined_call_operand.vmem [shape: f32[2,2,32], index: 8, kind: output, shape index: {}]  }
   0x1 LB: > { %s3087_s28 = sadd.s32 4294967295, %s3752_s27   ;;  %p3091_p0 = scmp.ge.s32.totalorder %s3752_s27, 1  ;;  %s3752_s27 = sphi %s3808_s27, %s18_s27  }
   0x2   : > { %p331_p1 = scmp.lt.s32.totalorder %s3752_s27, 3 }
   0x4   : > { %p332_p2 = pnand %p3091_p0, %p331_p1 }
   0x5   : > { %p398_p3 = scmp.lt.s32.totalorder (!%p332_p2), %s3087_s28, 1  ;;  %vm449_vm0 = vcmask (!%p332_p2), 261120   ;;  %v3754_v16 = vmov (!%p332_p2), 0.0   ;;  %v477_v17 = vlaneseq (!%p332_p2)  ;;  %vm3755_vm1 = vmmov (!%p332_p2), 0   ;;  %s3756_s22 = smov (!%p332_p2), 96  }
   0x6   : > { %335 = sbr.rel (%p332_p2) target bundleno = 6691 (0x1a23), region = 52  ;;  %3351 = vmatprep.subr.bf16.mxu1 (!%p332_p2), %v3754_v16  ;;  %3367 = vmatprep.subr.bf16.mxu0 (!%p332_p2), %v3754_v16  ;;  %vm716_vm2 = vcmask (!%p332_p2), 130048   ;;  %vm809_vm3 = vcmask (!%p332_p2), 64512   ;;  %s3759_s12 = smov (!%p332_p2), 80   ;;  %vm839_vm4 = vcmask (!%p332_p2), 1043456   ;;  %vm1599_vm5 = vcmask (!%p332_p2), 523264  }
   0x7   : > { %3355 = vmatprep.mubr.msk.bf16.mxu1 (!%p332_p2), %vm3755_vm1, %v3754_v16  ;;  %3371 = vmatprep.mubr.msk.bf16.mxu0 (!%p332_p2), %vm3755_vm1, %v3754_v16  ;;  %v3859_v20 = vshrl.u32 (!%p332_p2), %v477_v17, 7  ;;  %s3760_s13 = smov (!%p332_p2), 112   ;;  %vm2860_vm6 = vcmask (!%p332_p2), 1044480   ;;  %vm2849_vm7 = vcmask (!%p332_p2), 1040384   ;;  %vm2948_vm8 = vcmask (!%p332_p2), 254976  }
   0x9   : > { %v3867_v22 = vsub.s32 (!%p332_p2), 0, %v3859_v20  ;;  %v3884_v33 = vsub.s32 (!%p332_p2), 1, %v3859_v20 }
   0xd   : > { %s4325_s28 = smov (!%p398_p3, %s3087_s28), 1 }
   0xe   : > { %s3249_s29 = sshll.u32 %s4325_s28, 4  ;;  %s3624_s30 = smul.u32 192, %s4325_s28 }
   0xf   : > { %s402_s11 = scalar_lea.vmem %s4315_s0, %s3249_s29  ;;  %s3252_s15 = sshll.u32 %s4325_s28, 6 }
  0x10   : > { %s3828_s14 = scalar_lea.vmem %s4317_s2, %s3624_s30  ;;  %v447_v0 = vld [vmem:[%s402_s11] sm:$0xff]  ;;  %v448_v1 = vld [vmem:[%s402_s11 + $0x8] sm:$0xff]  ;;  %s3836_s18 = scalar_lea.vmem %s4320_s5, %s3252_s15 }
  0x11   : > { %v450_v2 = vsel %vm449_vm0, %v447_v0, 0.0  ;;  %v453_v3 = vsel %vm449_vm0, %v448_v1, 0.0  ;;  %v3643_v14 = vld [vmem:[%s3828_s14] sm:$0xff]   ;;  %v3645_v18 = vld [vmem:[%s3828_s14 + $0x8] sm:$0xff]   ;;  %s3857_s21 = scalar_lea.vmem %s4321_s6, %s3249_s29  ;;  %s3625_s23 = smul.u32 40, %s4325_s28  ;;  %v3647_v42 = vld [vmem:[%s3828_s14 + $0x10] sm:$0xff]  }
  0x12   : > { %451 = vadd.xlane.f32.xlu0 %v450_v2  ;;  %v3644_v15 = vld [vmem:[%s3828_s14 + $0x20] sm:$0xff]   ;;  %3352 = vmatpush3.bf16.msra.mxu1 %v3643_v14  ;;  %v3646_v19 = vld [vmem:[%s3828_s14 + $0x28] sm:$0xff]   ;;  %v3648_v44 = vld [vmem:[%s3828_s14 + $0x18] sm:$0xff]   ;;  %s3094_s29 = sshll.u32 %s4325_s28, 1  ;;  %s3758_s11 = smov 64  }
  0x13   : > { %3368 = vmatpush3.bf16.msra.mxu0 %v3644_v15  ;;  %3353 = vmatprep.subr.bf16.mxu1 %v3754_v16  ;;  %v3864_v21 = vld [vmem:[%s3857_s21] sm:$0xff]  ;;  %s3879_s26 = scalar_lea.vmem %s4322_s7, %s3625_s23  ;;  %s406_s10 = scalar_lea.vmem %s4316_s1, %s3094_s29 }
  0x14   : > { %3369 = vmatprep.subr.bf16.mxu0 %v3754_v16  ;;  %v3871_v23 = vrot.slane %v3864_v21, %v3867_v22  ;;  %v442_v30 = vld [vmem:[%s3879_s26] sm:$0xff]  ;;  %s3761_s15 = smov 48   ;;  %s3250_s16 = sshll.u32 %s4325_s28, 5 }
  0x15   : > { %v480_v32 = vrot.slane %v442_v30, %v3867_v22  ;;  %v486_v36 = vrot.slane %v442_v30, %v3884_v33  ;;  %s4018_s20 = scalar_lea.vmem %s4318_s3, %s3250_s16  ;;  %s4056_s25 = scalar_lea.vmem %s4319_s4, %s3250_s16 }
  0x16   : > { %454 = vadd.xlane.f32.xlu0 %v453_v3  ;;  %3354 = vmatpush3.bf16.msra.mxu1 %v3645_v18 }
  0x17   : > { %3370 = vmatpush3.bf16.msra.mxu0 %v3646_v19  ;;  %3359 = vmatprep.subr.bf16.mxu1 %v3754_v16 }
  0x18   : > { %3381 = vmatprep.subr.bf16.mxu0 %v3754_v16 }
  0x2c   : > { %607 = vrot.lane.b32.xlu0 %v3871_v23, %s3756_s22 }
  0x30   : > { %1010 = vrot.lane.b32.xlu0 %v3871_v23, %s3759_s12 }
  0x34   : > { %949 = vrot.lane.b32.xlu0 %v3871_v23, %s3760_s13 }
  0x9f   : > { %v452_v4 = vpop.xlane.xlu0 %451 }
  0xa0   : > { %v457_v5 = vmul.f32 0.03125, %v452_v4  ;;  %v3757_v4 = vmov 1966171168  }
  0xa2   : > { %v459_v6 = vsub.f32 %v447_v0, %v457_v5  ;;  %v500_v5 = vunpack.c.l.s4 %v3757_v4 }
  0xa3   : > { %v455_v7 = vpop.xlane.xlu0 %454 }
  0xa4   : > { %v458_v8 = vmul.f32 0.03125, %v455_v7  ;;  %v461_v9 = vmul.f32 %v459_v6, %v459_v6  ;;  %v501_v7 = vunpack.c.0.s8 %v500_v5 }
  0xa6   : > { %v460_v10 = vsub.f32 %v448_v1, %v458_v8  ;;  %v463_v11 = vsel %vm449_vm0, %v461_v9, 0.0  ;;  %v504_v9 = vsub.s32 %v501_v7, %v3859_v20 }
  0xa7   : > { %464 = vadd.xlane.f32.xlu1 %v463_v11  ;;  %v608_v53 = vpop.permute.xlu0 %607 }
  0xa8   : > { %v462_v12 = vmul.f32 %v460_v10, %v460_v10 }
  0xaa   : > { %v466_v13 = vsel %vm449_vm0, %v462_v12, 0.0 }
  0xab   : > { %467 = vadd.xlane.f32.xlu1 %v466_v13 }
 0x134   : > { %v465_v24 = vpop.xlane.xlu1 %464 }
 0x135   : > { %v469_v25 = vmul.f32 0.03125, %v465_v24 }
 0x137   : > { %v471_v26 = vadd.f32 1e-12, %v469_v25 }
 0x138   : > { %v468_v27 = vpop.xlane.xlu1 %467 }
 0x139   : > { %3683 = vrsqrt.f32 %v471_v26  ;;  %v470_v28 = vmul.f32 0.03125, %v468_v27 }
 0x13b   : > { %v472_v29 = vadd.f32 1e-12, %v470_v28 }
 0x13d   : > { %3685 = vrsqrt.f32 %v472_v29 }
 0x143   : > { %v3684_v31 = vpop.eup %3683 }
 0x144   : > { %v475_v34 = vmul.f32 %v3684_v31, %v459_v6  ;;  %v3106_v6 = vld.sshfl [vmem:[%s406_s10] sm:$0x11 pattern:$0x75316420] }
 0x145   : > { %v498_v8 = vcombine.high %v3106_v6, %v3106_v6  ;;  %v505_v11 = vrot.slane %v3106_v6, %v504_v9 }
 0x146   : > { %v481_v37 = vmul.f32 %v480_v32, %v475_v34 }
 0x147   : > { %v3686_v35 = vpop.eup %3685  ;;  %v3938_v14 = vrot.slane %v505_v11, %v3867_v22 }
 0x148   : > { %v476_v38 = vmul.f32 %v3686_v35, %v460_v10  ;;  %v3887_v40 = vadd.f32 %v486_v36, %v481_v37  ;;  %v512_v10 = vrot.slane %v498_v8, %v504_v9 }
 0x14a   : > { %v482_v39 = vmul.f32 %v480_v32, %v476_v38  ;;  %v3935_v12 = vrot.slane %v512_v10, %v3867_v22 }
 0x14c   : > { %v3889_v41 = vadd.f32 %v486_v36, %v482_v39 }
 0x14e   : > { %v3894_v43 = vpack.c.bf16 %v3889_v41, %v3887_v40 }
 0x150   : > { %3356 = vmatmul.mubr.msk.bf16.vlgmr.msra.gmra.mrb[0].mxu1 %vm449_vm0, %v3894_v43  ;;  %3372 = vmatmul.mubr.msk.bf16.vlgmr.msra.gmra.mrb[0].mxu0 %vm449_vm0, %v3894_v43 }
 0x151   : > { %3360 = vmatpush3.bf16.msra.mxu1 %v3647_v42  ;;  %3363 = vmatprep.mubr.msk.bf16.mxu1 %vm3755_vm1, %v3754_v16 }
 0x152   : > { %3361 = vmatprep.subr.bf16.mxu1 %v3754_v16  ;;  %3383 = vmatprep.mubr.msk.bf16.mxu0 %vm3755_vm1, %v3754_v16 }
 0x155   : > { %3362 = vmatpush3.bf16.msra.mxu1 %v3648_v44 }
 0x156   : > { %3375 = vmatprep.subr.bf16.mxu1 %v3754_v16 }
 0x158   : > { %3364 = vmatmul.mubr.msk.bf16.vlgmr.msra.gmra.mrb[4].mxu1 %vm449_vm0, %v3894_v43 }
 0x159   : > { %3377 = vmatprep.mubr.msk.bf16.mxu1 %vm3755_vm1, %v3754_v16 }
 0x223   : > { %v582_v45 = vpop.f32.mrb[0].mxu1  ;;  %v3911_v46 = vpop.f32.mrb[0].mxu0 }
 0x224   : > { %v3357_v47 = vpop.f32.mrb[1].mxu1  ;;  %v3373_v48 = vpop.f32.mrb[1].mxu0  ;;  %v583_v63 = vadd.f32 %v582_v45, %v3871_v23 }
 0x225   : > { %v585_v49 = vpop.f32.mrb[2].mxu1  ;;  %v3913_v50 = vpop.f32.mrb[2].mxu0 }
 0x226   : > { %v3358_v51 = vpop.f32.mrb[3].mxu1  ;;  %v3374_v52 = vpop.f32.mrb[3].mxu0  ;;  %v586_v1 = vadd.f32 %v585_v49, %v3871_v23  ;;  %v712_v2 = vpack.c.bf16 %v583_v63, %v583_v63  ;;  %v3652_v63 = vld [vmem:[%s3828_s14 + $0x48] sm:$0xff]  }
 0x228   : > { %v713_v3 = vpack.c.bf16 %v586_v1, %v586_v1  ;;  %v3654_v1 = vld [vmem:[%s3828_s14 + $0x58] sm:$0xff]  }
 0x22b   : > { %v644_v54 = vpop.f32.mrb[4].mxu1 }
 0x22c   : > { %v645_v55 = vadd.f32 %v644_v54, %v608_v53  ;;  %v3365_v56 = vpop.f32.mrb[5].mxu1 }
 0x22d   : > { %v647_v57 = vpop.f32.mrb[6].mxu1 }
 0x22e   : > { %v714_v58 = vpack.c.bf16 %v645_v55, %v645_v55  ;;  %v648_v59 = vadd.f32 %v647_v57, %v608_v53  ;;  %v3366_v60 = vpop.f32.mrb[7].mxu1 }
 0x230   : > { %v715_v61 = vpack.c.bf16 %v648_v59, %v648_v59  ;;  %v721_v62 = vsel %vm716_vm2, %v714_v58, 0  ;;  %v3649_v59 = vld [vmem:[%s3828_s14 + $0x30] sm:$0xff]  }
 0x231   : > { %3376 = vmatpush3.bf16.xpose.msra.mxu1 %v721_v62  ;;  %v3651_v62 = vld [vmem:[%s3828_s14 + $0x38] sm:$0xff]  }
 0x232   : > { %v767_v0 = vsel %vm716_vm2, %v715_v61, 0  ;;  %3387 = vmatprep.subr.bf16.mxu1 %v3754_v16 }
 0x233   : > { %3382 = vmatpush3.bf16.xpose.msra.mxu0 %v767_v0  ;;  %v3653_v0 = vld [vmem:[%s3828_s14 + $0x50] sm:$0xff]  }
 0x234   : > { %3393 = vmatprep.subr.bf16.mxu0 %v3754_v16 }
 0x238   : > { %3378 = vmatmul.mubr.msk.bf16.vlgmr.msra.gmra.mrb[8].mxu1 %vm716_vm2, %v712_v2 }
 0x239   : > { %3389 = vmatprep.mubr.msk.bf16.mxu1 %vm3755_vm1, %v3754_v16 }
 0x23a   : > { %3384 = vmatmul.mubr.msk.bf16.vlgmr.msra.gmra.mrb[4].mxu0 %vm716_vm2, %v713_v3 }
 0x23b   : > { %3395 = vmatprep.mubr.msk.bf16.mxu0 %vm3755_vm1, %v3754_v16 }
 0x30b   : > { %v757_v13 = vpop.f32.mrb[8].mxu1 }
 0x30c   : > { %v3379_v15 = vpop.f32.mrb[9].mxu1  ;;  %v758_v27 = vadd.f32 %v757_v13, %v3938_v14  ;;  %v1011_v13 = vpop.permute.xlu0 %1010 }
 0x30d   : > { %v760_v17 = vpop.f32.mrb[10].mxu1  ;;  %v803_v18 = vpop.f32.mrb[4].mxu0 }
 0x30e   : > { %v804_v19 = vadd.f32 %v803_v18, %v3935_v12  ;;  %v3380_v24 = vpop.f32.mrb[11].mxu1  ;;  %v3385_v25 = vpop.f32.mrb[5].mxu0  ;;  %v810_v30 = vsel %vm809_vm3, %v758_v27, -inf }
 0x30f   : > { %v806_v26 = vpop.f32.mrb[6].mxu0 }
 0x310   : > { %v3386_v28 = vpop.f32.mrb[7].mxu0  ;;  %v813_v29 = vsel %vm809_vm3, %v804_v19, -inf }
 0x311   : > { %814 = vmax.xlane.f32.xlu1 %v813_v29  ;;  %v950_v29 = vpop.permute.xlu0 %949 }
 0x315   : > { %811 = vmax.xlane.f32.xlu1 %v810_v30 }
 0x39e   : > { %v815_v31 = vpop.xlane.xlu1 %814 }
 0x39f   : > { %v817_v32 = vsub.f32 %v804_v19, %v815_v31 }
 0x3a1   : > { %v820_v36 = vmul.f32 1.442695, %v817_v32 }
 0x3a2   : > { %v812_v34 = vpop.xlane.xlu1 %811 }
 0x3a3   : > { %v816_v35 = vsub.f32 %v758_v27, %v812_v34 }
 0x3a5   : > { %v818_v37 = vmul.f32 1.442695, %v816_v35 }
 0x3a7   : > { %3687 = vpow2.f32 %v818_v37 }
 0x3a8   : > { %3689 = vpow2.f32 %v820_v36 }
 0x3b1   : > { %v3688_v38 = vpop.eup %3687 }
 0x3b2   : > { %v822_v39 = vsel %vm809_vm3, %v3688_v38, 0.0  ;;  %v3690_v42 = vpop.eup %3689 }
 0x3b3   : > { %823 = vadd.xlane.f32.xlu1 %v822_v39  ;;  %v825_v44 = vsel %vm809_vm3, %v3690_v42, 0.0 }
 0x3b7   : > { %826 = vadd.xlane.f32.xlu1 %v825_v44 }
 0x3c8   : > { %668 = vrot.lane.b32.xlu1 %v3871_v23, %s3758_s11 }
 0x440   : > { %v824_v45 = vpop.xlane.xlu1 %823 }
 0x441   : > { %3691 = vrcp.f32 %v824_v45 }
 0x444   : > { %v827_v47 = vpop.xlane.xlu1 %826 }
 0x445   : > { %3693 = vrcp.f32 %v827_v47 }
 0x448   : > { %v669_v48 = vpop.permute.xlu1 %668 }
 0x449   : > { %v706_v49 = vadd.f32 %v3911_v46, %v669_v48  ;;  %v709_v51 = vadd.f32 %v3913_v50, %v669_v48  ;;  %v3650_v50 = vld [vmem:[%s3828_s14 + $0x40] sm:$0xff]  }
 0x44b   : > { %v3692_v52 = vpop.eup %3691  ;;  %v834_v53 = vpack.c.bf16 %v706_v49, %v706_v49  ;;  %v835_v54 = vpack.c.bf16 %v709_v51, %v709_v51 }
 0x44c   : > { %v829_v55 = vmul.f32 %v3692_v52, %v3688_v38 }
 0x44d   : > { %v841_v56 = vsel %vm839_vm4, %v834_v53, 0  ;;  %v887_v57 = vsel %vm839_vm4, %v835_v54, 0 }
 0x44e   : > { %3388 = vmatpush3.bf16.msra.mxu1 %v841_v56  ;;  %3394 = vmatpush3.bf16.msra.mxu0 %v887_v57  ;;  %v832_v58 = vpack.c.bf16 %v829_v55, %v829_v55 }
 0x44f   : > { %v3694_v60 = vpop.eup %3693  ;;  %3399 = vmatprep.subr.bf16.mxu1 %v3754_v16  ;;  %3407 = vmatprep.subr.bf16.mxu0 %v3754_v16 }
 0x450   : > { %v831_v46 = vmul.f32 %v3694_v60, %v3690_v42 }
 0x451   : > { %3390 = vmatmul.mubr.msk.bf16.vlgmr.msra.gmra.mrb[12].mxu1 %vm809_vm3, %v832_v58 }
 0x452   : > { %3400 = vmatpush3.bf16.msra.mxu1 %v3649_v59  ;;  %v833_v61 = vpack.c.bf16 %v831_v46, %v831_v46  ;;  %3403 = vmatprep.mubr.msk.bf16.mxu1 %vm3755_vm1, %v3754_v16 }
 0x453   : > { %3401 = vmatprep.subr.bf16.mxu1 %v3754_v16 }
 0x454   : > { %3396 = vmatmul.mubr.msk.bf16.vlgmr.msra.gmra.mrb[8].mxu0 %vm809_vm3, %v833_v61 }
 0x455   : > { %3408 = vmatpush3.bf16.msra.mxu0 %v3650_v50  ;;  %3411 = vmatprep.mubr.msk.bf16.mxu0 %vm3755_vm1, %v3754_v16 }
 0x456   : > { %3402 = vmatpush3.bf16.msra.mxu1 %v3651_v62  ;;  %3409 = vmatprep.subr.bf16.mxu0 %v3754_v16 }
 0x457   : > { %3415 = vmatprep.subr.bf16.mxu1 %v3754_v16 }
 0x459   : > { %3404 = vmatmul.mubr.msk.bf16.vlgmr.msra.gmra.mrb[16].mxu1 %vm449_vm0, %v3894_v43  ;;  %3410 = vmatpush3.bf16.msra.mxu0 %v3652_v63 }
 0x45a   : > { %3416 = vmatpush3.bf16.msra.mxu1 %v3653_v0  ;;  %3419 = vmatprep.mubr.msk.bf16.mxu1 %vm3755_vm1, %v3754_v16 }
 0x45b   : > { %3417 = vmatprep.subr.bf16.mxu1 %v3754_v16  ;;  %3423 = vmatprep.subr.bf16.mxu0 %v3754_v16 }
 0x45c   : > { %3412 = vmatmul.mubr.msk.bf16.vlgmr.msra.gmra.mrb[12].mxu0 %vm449_vm0, %v3894_v43 }
 0x45d   : > { %3425 = vmatprep.mubr.msk.bf16.mxu0 %vm3755_vm1, %v3754_v16 }
 0x45e   : > { %3418 = vmatpush3.bf16.msra.mxu1 %v3654_v1 }
 0x45f   : > { %3429 = vmatprep.subr.bf16.mxu1 %v3754_v16 }
 0x461   : > { %3420 = vmatmul.mubr.msk.bf16.vlgmr.msra.gmra.mrb[20].mxu1 %vm449_vm0, %v3894_v43 }
 0x462   : > { %3431 = vmatprep.mubr.msk.bf16.mxu1 %vm3755_vm1, %v3754_v16 }
 0x524   : > { %v3988_v2 = vpop.f32.mrb[12].mxu1 }
 0x525   : > { %v3391_v3 = vpop.f32.mrb[13].mxu1 }
 0x526   : > { %v880_v4 = vpop.f32.mrb[14].mxu1 }
 0x527   : > { %v3392_v5 = vpop.f32.mrb[15].mxu1  ;;  %v3990_v6 = vpop.f32.mrb[8].mxu0 }
 0x528   : > { %v929_v7 = vpack.c.bf16 %v3990_v6, %v3988_v2  ;;  %v3397_v8 = vpop.f32.mrb[9].mxu0 }
 0x529   : > { %v926_v9 = vpop.f32.mrb[10].mxu0 }
 0x52a   : > { %v3398_v10 = vpop.f32.mrb[11].mxu0 }
 0x52c   : > { %v986_v11 = vpop.f32.mrb[16].mxu1 }
 0x52d   : > { %v3405_v15 = vpop.f32.mrb[17].mxu1  ;;  %v987_v35 = vadd.f32 %v986_v11, %v950_v29 }
 0x52e   : > { %v989_v43 = vpop.f32.mrb[18].mxu1 }
 0x52f   : > { %v3406_v17 = vpop.f32.mrb[19].mxu1  ;;  %v1047_v18 = vpop.f32.mrb[12].mxu0  ;;  %v990_v39 = vadd.f32 %v989_v43, %v950_v29  ;;  %v1115_v42 = vpack.c.bf16 %v987_v35, %v987_v35 }
 0x530   : > { %v1048_v19 = vadd.f32 %v1047_v18, %v1011_v13  ;;  %v3413_v24 = vpop.f32.mrb[13].mxu0 }
 0x531   : > { %v1050_v25 = vpop.f32.mrb[14].mxu0  ;;  %v1116_v44 = vpack.c.bf16 %v990_v39, %v990_v39  ;;  %v1436_v39 = vrot.slane %v3864_v21, %v3884_v33 }
 0x532   : > { %v1117_v26 = vpack.c.bf16 %v1048_v19, %v1048_v19  ;;  %v1051_v27 = vadd.f32 %v1050_v25, %v1011_v13  ;;  %v3414_v28 = vpop.f32.mrb[15].mxu0  ;;  %v3655_v25 = vld [vmem:[%s4018_s20] sm:$0xff]  }
 0x534   : > { %v1123_v30 = vsel %vm716_vm2, %v1117_v26, 0  ;;  %v1118_v31 = vpack.c.bf16 %v1051_v27, %v1051_v27  ;;  %v1108_v32 = vpop.f32.mrb[20].mxu1  ;;  %v3656_v27 = vld [vmem:[%s4018_s20 + $0x8] sm:$0xff]  }
 0x535   : > { %v3421_v34 = vpop.f32.mrb[21].mxu1  ;;  %3424 = vmatpush3.bf16.xpose.msra.mxu0 %v1123_v30 }
 0x536   : > { %v1169_v36 = vsel %vm716_vm2, %v1118_v31, 0  ;;  %v1111_v37 = vpop.f32.mrb[22].mxu1  ;;  %3435 = vmatprep.subr.bf16.mxu0 %v3754_v16 }
 0x537   : > { %v3422_v38 = vpop.f32.mrb[23].mxu1  ;;  %3430 = vmatpush3.bf16.xpose.msra.mxu1 %v1169_v36 }
 0x538   : > { %3441 = vmatprep.subr.bf16.mxu1 %v3754_v16 }
 0x53c   : > { %3426 = vmatmul.mubr.msk.bf16.vlgmr.msra.gmra.mrb[16].mxu0 %vm716_vm2, %v1115_v42 }
 0x53d   : > { %3437 = vmatprep.mubr.msk.bf16.mxu0 %vm3755_vm1, %v3754_v16 }
 0x53e   : > { %3432 = vmatmul.mubr.msk.bf16.vlgmr.msra.gmra.mrb[24].mxu1 %vm716_vm2, %v1116_v44 }
 0x53f   : > { %3443 = vmatprep.mubr.msk.bf16.mxu1 %vm3755_vm1, %v3754_v16 }
 0x60f   : > { %v1159_v45 = vpop.f32.mrb[16].mxu0 }
 0x610   : > { %v1160_v47 = vadd.f32 %v1159_v45, %v3938_v14  ;;  %v3427_v48 = vpop.f32.mrb[17].mxu0 }
 0x611   : > { %v1162_v49 = vpop.f32.mrb[18].mxu0  ;;  %v1205_v51 = vpop.f32.mrb[24].mxu1 }
 0x612   : > { %v1206_v52 = vadd.f32 %v1205_v51, %v3935_v12  ;;  %v3428_v53 = vpop.f32.mrb[19].mxu0  ;;  %v3433_v54 = vpop.f32.mrb[25].mxu1  ;;  %v1211_v55 = vsel %vm809_vm3, %v1160_v47, -inf }
 0x613   : > { %v1208_v56 = vpop.f32.mrb[26].mxu1  ;;  %1212 = vmax.xlane.f32.xlu0 %v1211_v55 }
 0x614   : > { %v3434_v57 = vpop.f32.mrb[27].mxu1  ;;  %v1214_v58 = vsel %vm809_vm3, %v1206_v52, -inf }
 0x615   : > { %1215 = vmax.xlane.f32.xlu1 %v1214_v58 }
 0x6a0   : > { %v1213_v59 = vpop.xlane.xlu0 %1212 }
 0x6a1   : > { %v1217_v60 = vsub.f32 %v1160_v47, %v1213_v59 }
 0x6a2   : > { %v1216_v46 = vpop.xlane.xlu1 %1215 }
 0x6a3   : > { %v1219_v50 = vmul.f32 1.442695, %v1217_v60  ;;  %v1218_v61 = vsub.f32 %v1206_v52, %v1216_v46 }
 0x6a5   : > { %3695 = vpow2.f32 %v1219_v50  ;;  %v1221_v62 = vmul.f32 1.442695, %v1218_v61 }
 0x6a7   : > { %3697 = vpow2.f32 %v1221_v62 }
 0x6af   : > { %v3696_v63 = vpop.eup %3695 }
 0x6b0   : > { %v1223_v0 = vsel %vm809_vm3, %v3696_v63, 0.0 }
 0x6b1   : > { %v3698_v1 = vpop.eup %3697  ;;  %1224 = vadd.xlane.f32.xlu0 %v1223_v0  ;;  %v3658_v0 = vld [vmem:[%s4056_s25 + $0x8] sm:$0xff]  }
 0x6b2   : > { %v1226_v3 = vsel %vm809_vm3, %v3698_v1, 0.0 }
 0x6b5   : > { %1227 = vadd.xlane.f32.xlu0 %v1226_v3 }
 0x6cb   : > { %1071 = vrot.lane.b32.xlu0 %v3871_v23, %s3761_s15 }
 0x73e   : > { %v1225_v4 = vpop.xlane.xlu0 %1224 }
 0x73f   : > { %3699 = vrcp.f32 %v1225_v4 }
 0x742   : > { %v1228_v5 = vpop.xlane.xlu0 %1227 }
 0x743   : > { %3701 = vrcp.f32 %v1228_v5 }
 0x746   : > { %v1072_v8 = vpop.permute.xlu0 %1071 }
 0x747   : > { %v1109_v9 = vadd.f32 %v1108_v32, %v1072_v8  ;;  %v1112_v10 = vadd.f32 %v1111_v37, %v1072_v8 }
 0x749   : > { %v3700_v11 = vpop.eup %3699  ;;  %v1235_v13 = vpack.c.bf16 %v1109_v9, %v1109_v9  ;;  %v1236_v15 = vpack.c.bf16 %v1112_v10, %v1112_v10  ;;  %v4063_v10 = vsub.s32 2, %v3859_v20 }
 0x74a   : > { %v1230_v43 = vmul.f32 %v3700_v11, %v3696_v63 }
 0x74b   : > { %v1241_v23 = vsel %vm839_vm4, %v1235_v13, 0  ;;  %v1287_v17 = vsel %vm839_vm4, %v1236_v15, 0  ;;  %v1470_v13 = vrot.slane %v3864_v21, %v4063_v10 }
 0x74c   : > { %3436 = vmatpush3.bf16.msra.mxu0 %v1241_v23  ;;  %3442 = vmatpush3.bf16.msra.mxu1 %v1287_v17  ;;  %v1233_v18 = vpack.c.bf16 %v1230_v43, %v1230_v43  ;;  %v1475_v43 = vsub.s32 3, %v3859_v20 }
 0x74d   : > { %v3702_v19 = vpop.eup %3701  ;;  %3453 = vmatprep.subr.bf16.mxu1 %v3754_v16  ;;  %3447 = vmatprep.subr.bf16.mxu0 %v3754_v16 }
 0x74e   : > { %v1232_v24 = vmul.f32 %v3702_v19, %v3698_v1  ;;  %v1476_v19 = vrot.slane %v3864_v21, %v1475_v43 }
 0x74f   : > { %3438 = vmatmul.mubr.msk.bf16.vlgmr.msra.gmra.mrb[20].mxu0 %vm809_vm3, %v1233_v18 }
 0x750   : > { %v1234_v26 = vpack.c.bf16 %v1232_v24, %v1232_v24  ;;  %3449 = vmatprep.mubr.msk.bf16.mxu0 %vm3755_vm1, %v3754_v16  ;;  %3448 = vmatpush3.bf16.msra.mxu0 %v3656_v27 }
 0x751   : > { %3459 = vmatprep.subr.bf16.mxu0 %v3754_v16 }
 0x752   : > { %3444 = vmatmul.mubr.msk.bf16.vlgmr.msra.gmra.mrb[28].mxu1 %vm809_vm3, %v1234_v26 }
 0x753   : > { %3454 = vmatpush3.bf16.msra.mxu1 %v3655_v25  ;;  %3455 = vmatprep.mubr.msk.bf16.mxu1 %vm3755_vm1, %v3754_v16 }
 0x754   : > { %3467 = vmatprep.subr.bf16.mxu1 %v3754_v16 }
 0x75a   : > { %3456 = vmatmul.mubr.msk.bf16.vlgmr.msra.gmra.mrb[32].mxu1 %vm716_vm2, %v929_v7 }
 0x75b   : > { %3475 = vmatprep.mubr.msk.bf16.mxu1 %vm3755_vm1, %v3754_v16 }
 0x822   : > { %v1277_v28 = vpop.f32.mrb[20].mxu0 }
 0x823   : > { %v3439_v29 = vpop.f32.mrb[21].mxu0 }
 0x824   : > { %v1280_v30 = vpop.f32.mrb[22].mxu0  ;;  %v3660_v29 = vld [vmem:[%s3836_s18 + $0x8] sm:$0xff]  }
 0x825   : > { %v3440_v31 = vpop.f32.mrb[23].mxu0  ;;  %v1323_v32 = vpop.f32.mrb[28].mxu1  ;;  %v3661_v30 = vld [vmem:[%s3836_s18 + $0x10] sm:$0xff]  }
 0x826   : > { %v1329_v34 = vpack.c.bf16 %v1323_v32, %v1277_v28  ;;  %v3445_v35 = vpop.f32.mrb[29].mxu1  ;;  %v3659_v28 = vld [vmem:[%s3836_s18] sm:$0xff]   ;;  %v3662_v31 = vld [vmem:[%s3836_s18 + $0x18] sm:$0xff]   ;;  %v1486_v32 = vsub.s32 4, %v3859_v20 }
 0x827   : > { %v1326_v36 = vpop.f32.mrb[30].mxu1  ;;  %3468 = vmatpush3.bf16.msra.mxu1 %v3659_v28  ;;  %v3663_v28 = vld [vmem:[%s3828_s14 + $0x60] sm:$0xff]  }
 0x828   : > { %v3446_v37 = vpop.f32.mrb[31].mxu1  ;;  %3450 = vmatmul.mubr.msk.bf16.vlgmr.msra.gmra.mrb[24].mxu0 %vm716_vm2, %v1329_v34  ;;  %3469 = vmatprep.subr.bf16.mxu1 %v3754_v16  ;;  %v1487_v34 = vrot.slane %v3864_v21, %v1486_v32 }
 0x829   : > { %3463 = vmatprep.mubr.msk.bf16.mxu0 %vm3755_vm1, %v3754_v16 }
 0x82b   : > { %3470 = vmatpush3.bf16.msra.mxu1 %v3660_v29  ;;  %v3664_v29 = vld [vmem:[%s3828_s14 + $0x80] sm:$0xff]  }
 0x82c   : > { %3471 = vmatprep.subr.bf16.mxu1 %v3754_v16 }
 0x82d   : > { %v1426_v2 = vpop.f32.mrb[32].mxu1 }
 0x82e   : > { %v3457_v6 = vpop.f32.mrb[33].mxu1 }
 0x82f   : > { %v1429_v7 = vpop.f32.mrb[34].mxu1  ;;  %3472 = vmatpush3.bf16.msra.mxu1 %v3661_v30  ;;  %v3665_v30 = vld [vmem:[%s3828_s14 + $0x68] sm:$0xff]  }
 0x830   : > { %v3458_v38 = vpop.f32.mrb[35].mxu1  ;;  %3473 = vmatprep.subr.bf16.mxu1 %v3754_v16 }
 0x833   : > { %3474 = vmatpush3.bf16.msra.mxu1 %v3662_v31  ;;  %v3666_v31 = vld [vmem:[%s3828_s14 + $0x88] sm:$0xff]  }
 0x834   : > { %3495 = vmatprep.subr.bf16.mxu1 %v3754_v16 }
 0x8fb   : > { %v1376_v42 = vpop.f32.mrb[24].mxu0 }
 0x8fc   : > { %v1427_v44 = vadd.f32 %v1426_v2, %v1376_v42  ;;  %v3451_v45 = vpop.f32.mrb[25].mxu0 }
 0x8fd   : > { %v1379_v47 = vpop.f32.mrb[26].mxu0 }
 0x8fe   : > { %v1437_v48 = vadd.f32 %v1436_v39, %v1427_v44  ;;  %v1430_v49 = vadd.f32 %v1429_v7, %v1379_v47  ;;  %v3452_v51 = vpop.f32.mrb[27].mxu0 }
 0x900   : > { %v1438_v52 = vadd.f32 %v1436_v39, %v1430_v49  ;;  %v1439_v53 = vadd.f32 %v1437_v48, %v3887_v40 }
 0x902   : > { %v1441_v54 = vsel %vm449_vm0, %v1439_v53, 0.0  ;;  %v1440_v55 = vadd.f32 %v1438_v52, %v3889_v41  ;;  %v3657_v41 = vld [vmem:[%s4056_s25] sm:$0xff]  }
 0x903   : > { %1442 = vadd.xlane.f32.xlu1 %v1441_v54  ;;  %3460 = vmatpush3.bf16.msra.mxu0 %v3657_v41 }
 0x904   : > { %v1444_v56 = vsel %vm449_vm0, %v1440_v55, 0.0  ;;  %3461 = vmatprep.subr.bf16.mxu0 %v3754_v16 }
 0x907   : > { %1445 = vadd.xlane.f32.xlu1 %v1444_v56  ;;  %3462 = vmatpush3.bf16.msra.mxu0 %v3658_v0 }
 0x908   : > { %3479 = vmatprep.subr.bf16.mxu0 %v3754_v16 }
 0x990   : > { %v1443_v57 = vpop.xlane.xlu1 %1442 }
 0x991   : > { %v1447_v58 = vmul.f32 0.03125, %v1443_v57 }
 0x993   : > { %v1449_v59 = vsub.f32 %v1439_v53, %v1447_v58 }
 0x994   : > { %v1446_v60 = vpop.xlane.xlu1 %1445 }
 0x995   : > { %v1448_v46 = vmul.f32 0.03125, %v1446_v60  ;;  %v1451_v50 = vmul.f32 %v1449_v59, %v1449_v59 }
 0x997   : > { %v1450_v61 = vsub.f32 %v1440_v55, %v1448_v46  ;;  %v1453_v62 = vsel %vm449_vm0, %v1451_v50, 0.0  ;;  %v1573_v50 = vsub.s32 5, %v3859_v20 }
 0x998   : > { %1454 = vadd.xlane.f32.xlu1 %v1453_v62 }
 0x999   : > { %v1452_v40 = vmul.f32 %v1450_v61, %v1450_v61 }
 0x99b   : > { %v1456_v63 = vsel %vm449_vm0, %v1452_v40, 0.0 }
 0x99c   : > { %1457 = vadd.xlane.f32.xlu1 %v1456_v63 }
 0xa25   : > { %v1455_v1 = vpop.xlane.xlu1 %1454 }
 0xa26   : > { %v1459_v3 = vmul.f32 0.03125, %v1455_v1 }
 0xa28   : > { %v1461_v4 = vadd.f32 1e-12, %v1459_v3 }
 0xa29   : > { %v1458_v5 = vpop.xlane.xlu1 %1457 }
 0xa2a   : > { %3703 = vrsqrt.f32 %v1461_v4  ;;  %v1460_v8 = vmul.f32 0.03125, %v1458_v5 }
 0xa2c   : > { %v1462_v9 = vadd.f32 1e-12, %v1460_v8 }
 0xa2e   : > { %3705 = vrsqrt.f32 %v1462_v9 }
 0xa34   : > { %v3704_v11 = vpop.eup %3703 }
 0xa35   : > { %v1465_v15 = vmul.f32 %v3704_v11, %v1449_v59 }
 0xa37   : > { %v1471_v17 = vmul.f32 %v1470_v13, %v1465_v15 }
 0xa38   : > { %v3706_v23 = vpop.eup %3705 }
 0xa39   : > { %v1466_v18 = vmul.f32 %v3706_v23, %v1450_v61  ;;  %v1477_v25 = vadd.f32 %v1476_v19, %v1471_v17  ;;  %v1574_v61 = vrot.slane %v3864_v21, %v1573_v50 }
 0xa3b   : > { %v1472_v24 = vmul.f32 %v1470_v13, %v1466_v18 }
 0xa3d   : > { %v1478_v26 = vadd.f32 %v1476_v19, %v1472_v24 }
 0xa3f   : > { %v1479_v27 = vpack.c.bf16 %v1478_v26, %v1477_v25 }
 0xa41   : > { %3464 = vmatmul.mubr.msk.bf16.vlgmr.msra.gmra.mrb[28].mxu0 %vm449_vm0, %v1479_v27 }
 0xa42   : > { %3483 = vmatprep.mubr.msk.bf16.mxu0 %vm3755_vm1, %v3754_v16  ;;  %3480 = vmatpush3.bf16.msra.mxu0 %v3663_v28 }
 0xa43   : > { %3481 = vmatprep.subr.bf16.mxu0 %v3754_v16 }
 0xa46   : > { %3482 = vmatpush3.bf16.msra.mxu0 %v3665_v30 }
 0xa47   : > { %3487 = vmatprep.subr.bf16.mxu0 %v3754_v16 }
 0xb14   : > { %v1537_v35 = vpop.f32.mrb[28].mxu0 }
 0xb15   : > { %v1538_v36 = vadd.f32 %v1537_v35, %v1487_v34  ;;  %v3465_v37 = vpop.f32.mrb[29].mxu0 }
 0xb16   : > { %v1540_v2 = vpop.f32.mrb[30].mxu0 }
 0xb17   : > { %v1546_v6 = vmul.f32 0.044715, %v1538_v36  ;;  %v1541_v7 = vadd.f32 %v1540_v2, %v1487_v34  ;;  %v3466_v38 = vpop.f32.mrb[31].mxu0  ;;  %v1544_v56 = vmul.f32 0.5, %v1538_v36 }
 0xb19   : > { %v1548_v39 = vmul.f32 %v1546_v6, %v1538_v36  ;;  %v1547_v42 = vmul.f32 0.044715, %v1541_v7  ;;  %v1545_v57 = vmul.f32 0.5, %v1541_v7  ;;  %v1674_v6 = vsub.s32 6, %v3859_v20 }
 0xb1b   : > { %v1550_v44 = vmul.f32 %v1548_v39, %v1538_v36  ;;  %v1549_v45 = vmul.f32 %v1547_v42, %v1541_v7  ;;  %v1675_v38 = vrot.slane %v3864_v21, %v1674_v6  ;;  %v1680_v39 = vsub.s32 7, %v3859_v20 }
 0xb1d   : > { %v1552_v47 = vadd.f32 %v1550_v44, %v1538_v36  ;;  %v1551_v48 = vmul.f32 %v1549_v45, %v1541_v7  ;;  %v1681_v45 = vrot.slane %v3864_v21, %v1680_v39  ;;  %v3668_v21 = vld [vmem:[%s3828_s14 + $0x78] sm:$0xff]  }
 0xb1f   : > { %v1554_v49 = vmul.f32 0.7978846, %v1552_v47  ;;  %v1553_v51 = vadd.f32 %v1551_v48, %v1541_v7 }
 0xb21   : > { %3707 = vtanh.f32 %v1554_v49  ;;  %v1555_v52 = vmul.f32 0.7978846, %v1553_v51 }
 0xb23   : > { %3709 = vtanh.f32 %v1555_v52 }
 0xb2b   : > { %v3708_v53 = vpop.eup %3707 }
 0xb2c   : > { %v1558_v54 = vadd.f32 1.0, %v3708_v53  ;;  %v3667_v53 = vld [vmem:[%s3828_s14 + $0x70] sm:$0xff]  }
 0xb2d   : > { %v3710_v55 = vpop.eup %3709 }
 0xb2e   : > { %v1559_v58 = vadd.f32 1.0, %v3710_v55  ;;  %v1560_v59 = vmul.f32 %v1558_v54, %v1544_v56 }
 0xb30   : > { %v1561_v60 = vmul.f32 %v1559_v58, %v1545_v57 }
 0xb32   : > { %v1562_v46 = vpack.c.bf16 %v1561_v60, %v1560_v59 }
 0xb34   : > { %3476 = vmatmul.mubr.msk.bf16.vlgmr.msra.gmra.mrb[36].mxu1 %vm1599_vm5, %v1562_v46 }
 0xb35   : > { %3499 = vmatprep.mubr.msk.bf16.mxu1 %vm3755_vm1, %v3754_v16  ;;  %3496 = vmatpush3.bf16.msra.mxu1 %v3664_v29 }
 0xb36   : > { %3497 = vmatprep.subr.bf16.mxu1 %v3754_v16 }
 0xb39   : > { %3498 = vmatpush3.bf16.msra.mxu1 %v3666_v31 }
 0xb3a   : > { %3509 = vmatprep.subr.bf16.mxu1 %v3754_v16 }
 0xc07   : > { %v1637_v62 = vpop.f32.mrb[36].mxu1 }
 0xc08   : > { %v1638_v40 = vadd.f32 %v1637_v62, %v1574_v61  ;;  %v3477_v63 = vpop.f32.mrb[37].mxu1 }
 0xc09   : > { %v1640_v41 = vpop.f32.mrb[38].mxu1 }
 0xc0a   : > { %v1641_v0 = vadd.f32 %v1640_v41, %v1574_v61  ;;  %v3478_v1 = vpop.f32.mrb[39].mxu1  ;;  %v1644_v3 = vadd.f32 %v1638_v40, %v1477_v25 }
 0xc0c   : > { %v1646_v4 = vsel %vm449_vm0, %v1644_v3, 0.0  ;;  %v1645_v5 = vadd.f32 %v1641_v0, %v1478_v26  ;;  %v4098_v26 = vld [vmem:[%s3857_s21 + $0x8] sm:$0xff]  ;;  %s440_s21 = scalar_lea.vmem %s4323_s8, %s3094_s29 }
 0xc0d   : > { %1647 = vadd.xlane.f32.xlu1 %v1646_v4  ;;  %v4102_v27 = vrot.slane %v4098_v26, %v3867_v22 }
 0xc0e   : > { %v1649_v8 = vsel %vm449_vm0, %v1645_v5, 0.0 }
 0xc11   : > { %1650 = vadd.xlane.f32.xlu1 %v1649_v8 }
 0xc9a   : > { %v1648_v9 = vpop.xlane.xlu1 %1647 }
 0xc9b   : > { %v1652_v11 = vmul.f32 0.03125, %v1648_v9 }
 0xc9d   : > { %v1654_v13 = vsub.f32 %v1644_v3, %v1652_v11 }
 0xc9e   : > { %v1651_v15 = vpop.xlane.xlu1 %1650 }
 0xc9f   : > { %v1653_v23 = vmul.f32 0.03125, %v1651_v15  ;;  %v1656_v17 = vmul.f32 %v1654_v13, %v1654_v13 }
 0xca1   : > { %v1655_v18 = vsub.f32 %v1645_v5, %v1653_v23  ;;  %v1658_v19 = vsel %vm449_vm0, %v1656_v17, 0.0 }
 0xca2   : > { %1659 = vadd.xlane.f32.xlu0 %v1658_v19 }
 0xca3   : > { %v1657_v24 = vmul.f32 %v1655_v18, %v1655_v18 }
 0xca5   : > { %v1661_v25 = vsel %vm449_vm0, %v1657_v24, 0.0 }
 0xca6   : > { %1662 = vadd.xlane.f32.xlu1 %v1661_v25 }
 0xcb7   : > { %1770 = vrot.lane.b32.xlu1 %v4102_v27, %s3756_s22 }
 0xd2f   : > { %v1660_v22 = vpop.xlane.xlu0 %1659 }
 0xd30   : > { %v1664_v34 = vmul.f32 0.03125, %v1660_v22 }
 0xd32   : > { %v1666_v35 = vadd.f32 1e-12, %v1664_v34 }
 0xd33   : > { %v1663_v36 = vpop.xlane.xlu1 %1662 }
 0xd34   : > { %3711 = vrsqrt.f32 %v1666_v35  ;;  %v1665_v37 = vmul.f32 0.03125, %v1663_v36 }
 0xd36   : > { %v1667_v2 = vadd.f32 1e-12, %v1665_v37 }
 0xd37   : > { %v1771_v62 = vpop.permute.xlu1 %1770 }
 0xd38   : > { %3713 = vrsqrt.f32 %v1667_v2 }
 0xd3e   : > { %v3712_v7 = vpop.eup %3711 }
 0xd3f   : > { %v1670_v42 = vmul.f32 %v3712_v7, %v1654_v13 }
 0xd41   : > { %v1676_v47 = vmul.f32 %v1675_v38, %v1670_v42 }
 0xd42   : > { %v3714_v44 = vpop.eup %3713 }
 0xd43   : > { %v1671_v48 = vmul.f32 %v3714_v44, %v1655_v18  ;;  %v4122_v51 = vadd.f32 %v1681_v45, %v1676_v47 }
 0xd45   : > { %v1677_v49 = vmul.f32 %v1675_v38, %v1671_v48 }
 0xd47   : > { %v4124_v52 = vadd.f32 %v1681_v45, %v1677_v49 }
 0xd49   : > { %v4129_v54 = vpack.c.bf16 %v4124_v52, %v4122_v51 }
 0xd4b   : > { %3484 = vmatmul.mubr.msk.bf16.vlgmr.msra.gmra.mrb[32].mxu0 %vm449_vm0, %v4129_v54  ;;  %3500 = vmatmul.mubr.msk.bf16.vlgmr.msra.gmra.mrb[40].mxu1 %vm449_vm0, %v4129_v54 }
 0xd4c   : > { %3488 = vmatpush3.bf16.msra.mxu0 %v3667_v53  ;;  %3491 = vmatprep.mubr.msk.bf16.mxu0 %vm3755_vm1, %v3754_v16 }
 0xd4d   : > { %3489 = vmatprep.subr.bf16.mxu0 %v3754_v16  ;;  %3511 = vmatprep.mubr.msk.bf16.mxu1 %vm3755_vm1, %v3754_v16 }
 0xd50   : > { %3490 = vmatpush3.bf16.msra.mxu0 %v3668_v21 }
 0xd51   : > { %3503 = vmatprep.subr.bf16.mxu0 %v3754_v16 }
 0xd53   : > { %3492 = vmatmul.mubr.msk.bf16.vlgmr.msra.gmra.mrb[36].mxu0 %vm449_vm0, %v4129_v54 }
 0xd54   : > { %3505 = vmatprep.mubr.msk.bf16.mxu0 %vm3755_vm1, %v3754_v16 }
 0xe1e   : > { %v1745_v55 = vpop.f32.mrb[32].mxu0  ;;  %v4146_v56 = vpop.f32.mrb[40].mxu1 }
 0xe1f   : > { %v3485_v57 = vpop.f32.mrb[33].mxu0  ;;  %v3501_v58 = vpop.f32.mrb[41].mxu1  ;;  %v1746_v9 = vadd.f32 %v1745_v55, %v4102_v27 }
 0xe20   : > { %v1748_v59 = vpop.f32.mrb[34].mxu0  ;;  %v4148_v60 = vpop.f32.mrb[42].mxu1 }
 0xe21   : > { %v3486_v46 = vpop.f32.mrb[35].mxu0  ;;  %v3502_v61 = vpop.f32.mrb[43].mxu1  ;;  %v1749_v13 = vadd.f32 %v1748_v59, %v4102_v27  ;;  %v1875_v15 = vpack.c.bf16 %v1746_v9, %v1746_v9 }
 0xe23   : > { %v1876_v23 = vpack.c.bf16 %v1749_v13, %v1749_v13 }
 0xe26   : > { %v1807_v40 = vpop.f32.mrb[36].mxu0 }
 0xe27   : > { %v1808_v63 = vadd.f32 %v1807_v40, %v1771_v62  ;;  %v3493_v41 = vpop.f32.mrb[37].mxu0 }
 0xe28   : > { %v1810_v0 = vpop.f32.mrb[38].mxu0  ;;  %v3669_v41 = vld [vmem:[%s3828_s14 + $0x90] sm:$0xff]  }
 0xe29   : > { %v1877_v1 = vpack.c.bf16 %v1808_v63, %v1808_v63  ;;  %v1811_v3 = vadd.f32 %v1810_v0, %v1771_v62  ;;  %v3494_v4 = vpop.f32.mrb[39].mxu0 }
 0xe2a   : > { %v3672_v4 = vld [vmem:[%s3828_s14 + $0xa8] sm:$0xff]  }
 0xe2b   : > { %v1883_v5 = vsel %vm716_vm2, %v1877_v1, 0  ;;  %v1878_v8 = vpack.c.bf16 %v1811_v3, %v1811_v3  ;;  %v3671_v3 = vld [vmem:[%s3828_s14 + $0x98] sm:$0xff]  }
 0xe2c   : > { %3504 = vmatpush3.bf16.xpose.msra.mxu0 %v1883_v5  ;;  %v3673_v5 = vld [vmem:[%s3828_s14 + $0xb0] sm:$0xff]  }
 0xe2d   : > { %v1929_v11 = vsel %vm716_vm2, %v1878_v8, 0  ;;  %3515 = vmatprep.subr.bf16.mxu0 %v3754_v16  ;;  %v3674_v8 = vld [vmem:[%s3828_s14 + $0xb8] sm:$0xff]  }
 0xe2e   : > { %3510 = vmatpush3.bf16.xpose.msra.mxu1 %v1929_v11 }
 0xe2f   : > { %3521 = vmatprep.subr.bf16.mxu1 %v3754_v16 }
 0xe33   : > { %3506 = vmatmul.mubr.msk.bf16.vlgmr.msra.gmra.mrb[40].mxu0 %vm716_vm2, %v1875_v15 }
 0xe34   : > { %3517 = vmatprep.mubr.msk.bf16.mxu0 %vm3755_vm1, %v3754_v16 }
 0xe35   : > { %3512 = vmatmul.mubr.msk.bf16.vlgmr.msra.gmra.mrb[44].mxu1 %vm716_vm2, %v1876_v23 }
 0xe36   : > { %3523 = vmatprep.mubr.msk.bf16.mxu1 %vm3755_vm1, %v3754_v16 }
 0xf06   : > { %v1919_v17 = vpop.f32.mrb[40].mxu0 }
 0xf07   : > { %v1920_v18 = vadd.f32 %v1919_v17, %v3938_v14  ;;  %v3507_v19 = vpop.f32.mrb[41].mxu0 }
 0xf08   : > { %v1922_v24 = vpop.f32.mrb[42].mxu0  ;;  %v1965_v25 = vpop.f32.mrb[44].mxu1 }
 0xf09   : > { %v1966_v28 = vadd.f32 %v1965_v25, %v3935_v12  ;;  %v3508_v29 = vpop.f32.mrb[43].mxu0  ;;  %v3513_v30 = vpop.f32.mrb[45].mxu1  ;;  %v1971_v31 = vsel %vm809_vm3, %v1920_v18, -inf }
 0xf0a   : > { %v1968_v22 = vpop.f32.mrb[46].mxu1  ;;  %1972 = vmax.xlane.f32.xlu0 %v1971_v31 }
 0xf0b   : > { %v3514_v34 = vpop.f32.mrb[47].mxu1  ;;  %v1974_v35 = vsel %vm809_vm3, %v1966_v28, -inf }
 0xf0c   : > { %1975 = vmax.xlane.f32.xlu1 %v1974_v35 }
 0xf1d   : > { %2171 = vrot.lane.b32.xlu1 %v4102_v27, %s3759_s12 }
 0xf97   : > { %v1973_v36 = vpop.xlane.xlu0 %1972 }
 0xf98   : > { %v1977_v37 = vsub.f32 %v1920_v18, %v1973_v36 }
 0xf99   : > { %v1976_v2 = vpop.xlane.xlu1 %1975 }
 0xf9a   : > { %v1979_v7 = vmul.f32 1.442695, %v1977_v37  ;;  %v1978_v38 = vsub.f32 %v1966_v28, %v1976_v2 }
 0xf9c   : > { %3715 = vpow2.f32 %v1979_v7  ;;  %v1981_v42 = vmul.f32 1.442695, %v1978_v38 }
 0xf9d   : > { %v2172_v29 = vpop.permute.xlu1 %2171 }
 0xf9e   : > { %3717 = vpow2.f32 %v1981_v42 }
 0xfa6   : > { %v3716_v44 = vpop.eup %3715 }
 0xfa7   : > { %v1983_v45 = vsel %vm809_vm3, %v3716_v44, 0.0 }
 0xfa8   : > { %v3718_v47 = vpop.eup %3717  ;;  %1984 = vadd.xlane.f32.xlu0 %v1983_v45 }
 0xfa9   : > { %v1986_v48 = vsel %vm809_vm3, %v3718_v47, 0.0 }
 0xfac   : > { %1987 = vadd.xlane.f32.xlu0 %v1986_v48 }
 0xfc2   : > { %1831 = vrot.lane.b32.xlu0 %v4102_v27, %s3758_s11 }
 0xfc6   : > { %2110 = vrot.lane.b32.xlu0 %v4102_v27, %s3760_s13 }
0x1035   : > { %v1985_v49 = vpop.xlane.xlu0 %1984 }
0x1036   : > { %3719 = vrcp.f32 %v1985_v49 }
0x1039   : > { %v1988_v53 = vpop.xlane.xlu0 %1987 }
0x103a   : > { %3721 = vrcp.f32 %v1988_v53 }
0x103d   : > { %v1832_v21 = vpop.permute.xlu0 %1831 }
0x103e   : > { %v1869_v55 = vadd.f32 %v4146_v56, %v1832_v21  ;;  %v1872_v57 = vadd.f32 %v4148_v60, %v1832_v21  ;;  %v3670_v60 = vld [vmem:[%s3828_s14 + $0xa0] sm:$0xff]  }
0x1040   : > { %v3720_v58 = vpop.eup %3719  ;;  %v1995_v59 = vpack.c.bf16 %v1869_v55, %v1869_v55  ;;  %v1996_v46 = vpack.c.bf16 %v1872_v57, %v1872_v57 }
0x1041   : > { %v1990_v61 = vmul.f32 %v3720_v58, %v3716_v44  ;;  %v2111_v7 = vpop.permute.xlu0 %2110 }
0x1042   : > { %v2001_v62 = vsel %vm839_vm4, %v1995_v59, 0  ;;  %v2047_v40 = vsel %vm839_vm4, %v1996_v46, 0 }
0x1043   : > { %3516 = vmatpush3.bf16.msra.mxu0 %v2001_v62  ;;  %3522 = vmatpush3.bf16.msra.mxu1 %v2047_v40  ;;  %v1993_v63 = vpack.c.bf16 %v1990_v61, %v1990_v61 }
0x1044   : > { %v3722_v0 = vpop.eup %3721  ;;  %3527 = vmatprep.subr.bf16.mxu0 %v3754_v16  ;;  %3535 = vmatprep.subr.bf16.mxu1 %v3754_v16 }
0x1045   : > { %v1992_v56 = vmul.f32 %v3722_v0, %v3718_v47 }
0x1046   : > { %3518 = vmatmul.mubr.msk.bf16.vlgmr.msra.gmra.mrb[44].mxu0 %vm809_vm3, %v1993_v63 }
0x1047   : > { %3528 = vmatpush3.bf16.msra.mxu0 %v3669_v41  ;;  %v1994_v1 = vpack.c.bf16 %v1992_v56, %v1992_v56  ;;  %3531 = vmatprep.mubr.msk.bf16.mxu0 %vm3755_vm1, %v3754_v16 }
0x1048   : > { %3529 = vmatprep.subr.bf16.mxu0 %v3754_v16 }
0x1049   : > { %3524 = vmatmul.mubr.msk.bf16.vlgmr.msra.gmra.mrb[48].mxu1 %vm809_vm3, %v1994_v1 }
0x104a   : > { %3536 = vmatpush3.bf16.msra.mxu1 %v3670_v60  ;;  %3539 = vmatprep.mubr.msk.bf16.mxu1 %vm3755_vm1, %v3754_v16 }
0x104b   : > { %3530 = vmatpush3.bf16.msra.mxu0 %v3671_v3  ;;  %3537 = vmatprep.subr.bf16.mxu1 %v3754_v16 }
0x104c   : > { %3543 = vmatprep.subr.bf16.mxu0 %v3754_v16 }
0x104e   : > { %3532 = vmatmul.mubr.msk.bf16.vlgmr.msra.gmra.mrb[48].mxu0 %vm449_vm0, %v4129_v54  ;;  %3538 = vmatpush3.bf16.msra.mxu1 %v3672_v4 }
0x104f   : > { %3544 = vmatpush3.bf16.msra.mxu0 %v3673_v5  ;;  %3547 = vmatprep.mubr.msk.bf16.mxu0 %vm3755_vm1, %v3754_v16 }
0x1050   : > { %3545 = vmatprep.subr.bf16.mxu0 %v3754_v16  ;;  %3551 = vmatprep.subr.bf16.mxu1 %v3754_v16 }
0x1051   : > { %3540 = vmatmul.mubr.msk.bf16.vlgmr.msra.gmra.mrb[52].mxu1 %vm449_vm0, %v4129_v54 }
0x1052   : > { %3553 = vmatprep.mubr.msk.bf16.mxu1 %vm3755_vm1, %v3754_v16 }
0x1053   : > { %3546 = vmatpush3.bf16.msra.mxu0 %v3674_v8 }
0x1054   : > { %3557 = vmatprep.subr.bf16.mxu0 %v3754_v16 }
0x1056   : > { %3548 = vmatmul.mubr.msk.bf16.vlgmr.msra.gmra.mrb[52].mxu0 %vm449_vm0, %v4129_v54 }
0x1057   : > { %3559 = vmatprep.mubr.msk.bf16.mxu0 %vm3755_vm1, %v3754_v16 }
0x1119   : > { %v4210_v9 = vpop.f32.mrb[44].mxu0 }
0x111a   : > { %v3519_v11 = vpop.f32.mrb[45].mxu0 }
0x111b   : > { %v2040_v13 = vpop.f32.mrb[46].mxu0 }
0x111c   : > { %v3520_v15 = vpop.f32.mrb[47].mxu0  ;;  %v4212_v23 = vpop.f32.mrb[48].mxu1 }
0x111d   : > { %v2089_v17 = vpack.c.bf16 %v4212_v23, %v4210_v9  ;;  %v3525_v18 = vpop.f32.mrb[49].mxu1 }
0x111e   : > { %v2086_v19 = vpop.f32.mrb[50].mxu1 }
0x111f   : > { %v3526_v24 = vpop.f32.mrb[51].mxu1 }
0x1121   : > { %v2147_v25 = vpop.f32.mrb[48].mxu0 }
0x1122   : > { %v3533_v28 = vpop.f32.mrb[49].mxu0  ;;  %v2148_v47 = vadd.f32 %v2147_v25, %v2111_v7 }
0x1123   : > { %v2150_v54 = vpop.f32.mrb[50].mxu0 }
0x1124   : > { %v3534_v30 = vpop.f32.mrb[51].mxu0  ;;  %v2208_v31 = vpop.f32.mrb[52].mxu1  ;;  %v2151_v21 = vadd.f32 %v2150_v54, %v2111_v7  ;;  %v2276_v55 = vpack.c.bf16 %v2148_v47, %v2148_v47 }
0x1125   : > { %v2209_v22 = vadd.f32 %v2208_v31, %v2172_v29  ;;  %v3541_v34 = vpop.f32.mrb[53].mxu1 }
0x1126   : > { %v2211_v35 = vpop.f32.mrb[54].mxu1  ;;  %v2277_v57 = vpack.c.bf16 %v2151_v21, %v2151_v21 }
0x1127   : > { %v2278_v36 = vpack.c.bf16 %v2209_v22, %v2209_v22  ;;  %v2212_v37 = vadd.f32 %v2211_v35, %v2172_v29  ;;  %v3542_v2 = vpop.f32.mrb[55].mxu1 }
0x1128   : > { %v3675_v2 = vld [vmem:[%s4018_s20 + $0x10] sm:$0xff]  }
0x1129   : > { %v2284_v38 = vsel %vm716_vm2, %v2278_v36, 0  ;;  %v2279_v42 = vpack.c.bf16 %v2212_v37, %v2212_v37  ;;  %v2269_v44 = vpop.f32.mrb[52].mxu0 }
0x112a   : > { %v3549_v45 = vpop.f32.mrb[53].mxu0  ;;  %3552 = vmatpush3.bf16.xpose.msra.mxu1 %v2284_v38  ;;  %v3676_v38 = vld [vmem:[%s4018_s20 + $0x18] sm:$0xff]  }
0x112b   : > { %v2330_v48 = vsel %vm716_vm2, %v2279_v42, 0  ;;  %v2272_v49 = vpop.f32.mrb[54].mxu0  ;;  %3563 = vmatprep.subr.bf16.mxu1 %v3754_v16 }
0x112c   : > { %v3550_v53 = vpop.f32.mrb[55].mxu0  ;;  %3558 = vmatpush3.bf16.xpose.msra.mxu0 %v2330_v48 }
0x112d   : > { %3569 = vmatprep.subr.bf16.mxu0 %v3754_v16 }
0x1131   : > { %3554 = vmatmul.mubr.msk.bf16.vlgmr.msra.gmra.mrb[56].mxu1 %vm716_vm2, %v2276_v55 }
0x1132   : > { %3565 = vmatprep.mubr.msk.bf16.mxu1 %vm3755_vm1, %v3754_v16 }
0x1133   : > { %3560 = vmatmul.mubr.msk.bf16.vlgmr.msra.gmra.mrb[56].mxu0 %vm716_vm2, %v2277_v57 }
0x1134   : > { %3571 = vmatprep.mubr.msk.bf16.mxu0 %vm3755_vm1, %v3754_v16 }
0x1204   : > { %v2320_v58 = vpop.f32.mrb[56].mxu1 }
0x1205   : > { %v2321_v59 = vadd.f32 %v2320_v58, %v3938_v14  ;;  %v3555_v46 = vpop.f32.mrb[57].mxu1  ;;  %v2597_v58 = vrot.slane %v4098_v26, %v3884_v33 }
0x1206   : > { %v2323_v61 = vpop.f32.mrb[58].mxu1  ;;  %v2366_v62 = vpop.f32.mrb[56].mxu0 }
0x1207   : > { %v2367_v40 = vadd.f32 %v2366_v62, %v3935_v12  ;;  %v3556_v63 = vpop.f32.mrb[59].mxu1  ;;  %v3561_v41 = vpop.f32.mrb[57].mxu0  ;;  %v2372_v0 = vsel %vm809_vm3, %v2321_v59, -inf }
0x1208   : > { %2373 = vmax.xlane.f32.xlu0 %v2372_v0  ;;  %v2369_v56 = vpop.f32.mrb[58].mxu0 }
0x1209   : > { %v3562_v60 = vpop.f32.mrb[59].mxu0  ;;  %v2375_v1 = vsel %vm809_vm3, %v2367_v40, -inf }
0x120a   : > { %2376 = vmax.xlane.f32.xlu1 %v2375_v1 }
0x1295   : > { %v2374_v3 = vpop.xlane.xlu0 %2373 }
0x1296   : > { %v2378_v4 = vsub.f32 %v2321_v59, %v2374_v3 }
0x1297   : > { %v2377_v5 = vpop.xlane.xlu1 %2376 }
0x1298   : > { %v2380_v8 = vmul.f32 1.442695, %v2378_v4  ;;  %v2379_v14 = vsub.f32 %v2367_v40, %v2377_v5 }
0x129a   : > { %3723 = vpow2.f32 %v2380_v8  ;;  %v2382_v11 = vmul.f32 1.442695, %v2379_v14 }
0x129c   : > { %3725 = vpow2.f32 %v2382_v11 }
0x12a4   : > { %v3724_v13 = vpop.eup %3723 }
0x12a5   : > { %v2384_v12 = vsel %vm809_vm3, %v3724_v13, 0.0 }
0x12a6   : > { %v3726_v15 = vpop.eup %3725  ;;  %2385 = vadd.xlane.f32.xlu0 %v2384_v12 }
0x12a7   : > { %v2387_v18 = vsel %vm809_vm3, %v3726_v15, 0.0 }
0x12aa   : > { %2388 = vadd.xlane.f32.xlu0 %v2387_v18  ;;  %v3678_v18 = vld [vmem:[%s4056_s25 + $0x18] sm:$0xff]  }
0x12c0   : > { %2232 = vrot.lane.b32.xlu0 %v4102_v27, %s3761_s15 }
0x1333   : > { %v2386_v19 = vpop.xlane.xlu0 %2385 }
0x1334   : > { %3727 = vrcp.f32 %v2386_v19 }
0x1337   : > { %v2389_v24 = vpop.xlane.xlu0 %2388 }
0x1338   : > { %3729 = vrcp.f32 %v2389_v24 }
0x133b   : > { %v2233_v25 = vpop.permute.xlu0 %2232 }
0x133c   : > { %v2270_v28 = vadd.f32 %v2269_v44, %v2233_v25  ;;  %v2273_v29 = vadd.f32 %v2272_v49, %v2233_v25 }
0x133e   : > { %v3728_v54 = vpop.eup %3727  ;;  %v2396_v30 = vpack.c.bf16 %v2270_v28, %v2270_v28  ;;  %v2397_v31 = vpack.c.bf16 %v2273_v29, %v2273_v29 }
0x133f   : > { %v2391_v22 = vmul.f32 %v3728_v54, %v3724_v13 }
0x1340   : > { %v2402_v34 = vsel %vm839_vm4, %v2396_v30, 0  ;;  %v2448_v35 = vsel %vm839_vm4, %v2397_v31, 0  ;;  %v2631_v31 = vrot.slane %v4098_v26, %v4063_v10 }
0x1341   : > { %3564 = vmatpush3.bf16.msra.mxu1 %v2402_v34  ;;  %3570 = vmatpush3.bf16.msra.mxu0 %v2448_v35  ;;  %v2394_v27 = vpack.c.bf16 %v2391_v22, %v2391_v22 }
0x1342   : > { %v3730_v36 = vpop.eup %3729  ;;  %3581 = vmatprep.subr.bf16.mxu0 %v3754_v16  ;;  %3575 = vmatprep.subr.bf16.mxu1 %v3754_v16 }
0x1343   : > { %v2393_v37 = vmul.f32 %v3730_v36, %v3726_v15  ;;  %v2637_v36 = vrot.slane %v4098_v26, %v1475_v43  ;;  %v3682_v43 = vld [vmem:[%s3836_s18 + $0x38] sm:$0xff]  }
0x1344   : > { %3566 = vmatmul.mubr.msk.bf16.vlgmr.msra.gmra.mrb[60].mxu1 %vm809_vm3, %v2394_v27 }
0x1345   : > { %v2395_v7 = vpack.c.bf16 %v2393_v37, %v2393_v37  ;;  %3577 = vmatprep.mubr.msk.bf16.mxu1 %vm3755_vm1, %v3754_v16  ;;  %3576 = vmatpush3.bf16.msra.mxu1 %v3676_v38 }
0x1346   : > { %3587 = vmatprep.subr.bf16.mxu1 %v3754_v16 }
0x1347   : > { %3572 = vmatmul.mubr.msk.bf16.vlgmr.msra.gmra.mrb[60].mxu0 %vm809_vm3, %v2395_v7 }
0x1348   : > { %3582 = vmatpush3.bf16.msra.mxu0 %v3675_v2  ;;  %3583 = vmatprep.mubr.msk.bf16.mxu0 %vm3755_vm1, %v3754_v16 }
0x1349   : > { %3595 = vmatprep.subr.bf16.mxu0 %v3754_v16 }
0x134f   : > { %3584 = vmatmul.mubr.msk.bf16.vlgmr.msra.gmra.mrb[64].mxu0 %vm716_vm2, %v2089_v17 }
0x1350   : > { %3603 = vmatprep.mubr.msk.bf16.mxu0 %vm3755_vm1, %v3754_v16 }
0x1417   : > { %v2438_v42 = vpop.f32.mrb[60].mxu1 }
0x1418   : > { %v3567_v44 = vpop.f32.mrb[61].mxu1 }
0x1419   : > { %v2441_v45 = vpop.f32.mrb[62].mxu1  ;;  %v3680_v44 = vld [vmem:[%s3836_s18 + $0x28] sm:$0xff]  }
0x141a   : > { %v3568_v47 = vpop.f32.mrb[63].mxu1  ;;  %v2484_v48 = vpop.f32.mrb[60].mxu0  ;;  %v3681_v45 = vld [vmem:[%s3836_s18 + $0x30] sm:$0xff]  }
0x141b   : > { %v2490_v49 = vpack.c.bf16 %v2484_v48, %v2438_v42  ;;  %v3573_v53 = vpop.f32.mrb[61].mxu0  ;;  %v3679_v42 = vld [vmem:[%s3836_s18 + $0x20] sm:$0xff]   ;;  %v2649_v47 = vrot.slane %v4098_v26, %v1486_v32 }
0x141c   : > { %v2487_v21 = vpop.f32.mrb[62].mxu0  ;;  %3596 = vmatpush3.bf16.msra.mxu0 %v3679_v42 }
0x141d   : > { %v3574_v55 = vpop.f32.mrb[63].mxu0  ;;  %3578 = vmatmul.mubr.msk.bf16.vlgmr.msra.gmra.mrb[64].mxu1 %vm716_vm2, %v2490_v49  ;;  %3597 = vmatprep.subr.bf16.mxu0 %v3754_v16 }
0x141e   : > { %3591 = vmatprep.mubr.msk.bf16.mxu1 %vm3755_vm1, %v3754_v16 }
0x1420   : > { %3598 = vmatpush3.bf16.msra.mxu0 %v3680_v44  ;;  %v445_v44 = vld [vmem:[%s3879_s26 + $0x18] sm:$0xff] }
0x1421   : > { %3599 = vmatprep.subr.bf16.mxu0 %v3754_v16 }
0x1422   : > { %v2587_v9 = vpop.f32.mrb[64].mxu0 }
0x1423   : > { %v3585_v23 = vpop.f32.mrb[65].mxu0 }
0x1424   : > { %v2590_v17 = vpop.f32.mrb[66].mxu0  ;;  %3600 = vmatpush3.bf16.msra.mxu0 %v3681_v45  ;;  %v446_v45 = vld [vmem:[%s3879_s26 + $0x20] sm:$0x7] }
0x1425   : > { %v3586_v57 = vpop.f32.mrb[67].mxu0  ;;  %3601 = vmatprep.subr.bf16.mxu0 %v3754_v16 }
0x1428   : > { %3602 = vmatpush3.bf16.msra.mxu0 %v3682_v43  ;;  %v3762_v43 = vmov 0.0|0.0  }
0x14f0   : > { %v2537_v59 = vpop.f32.mrb[64].mxu1 }
0x14f1   : > { %v2588_v46 = vadd.f32 %v2587_v9, %v2537_v59  ;;  %v3579_v61 = vpop.f32.mrb[65].mxu1 }
0x14f2   : > { %v2540_v62 = vpop.f32.mrb[66].mxu1 }
0x14f3   : > { %v2598_v40 = vadd.f32 %v2597_v58, %v2588_v46  ;;  %v2591_v63 = vadd.f32 %v2590_v17, %v2540_v62  ;;  %v3580_v41 = vpop.f32.mrb[67].mxu1 }
0x14f5   : > { %v2599_v0 = vadd.f32 %v2597_v58, %v2591_v63  ;;  %v2600_v56 = vadd.f32 %v2598_v40, %v4122_v51 }
0x14f7   : > { %v2602_v60 = vsel %vm449_vm0, %v2600_v56, 0.0  ;;  %v2601_v1 = vadd.f32 %v2599_v0, %v4124_v52  ;;  %v3677_v52 = vld [vmem:[%s4056_s25 + $0x10] sm:$0xff]  }
0x14f8   : > { %2603 = vadd.xlane.f32.xlu1 %v2602_v60  ;;  %3588 = vmatpush3.bf16.msra.mxu1 %v3677_v52 }
0x14f9   : > { %v2605_v3 = vsel %vm449_vm0, %v2601_v1, 0.0  ;;  %3589 = vmatprep.subr.bf16.mxu1 %v3754_v16 }
0x14fc   : > { %2606 = vadd.xlane.f32.xlu1 %v2605_v3  ;;  %3590 = vmatpush3.bf16.msra.mxu1 %v3678_v18 }
0x14fd   : > { %3618 = vmatprep.subr.bf16.mxu1 %v3762_v43 }
0x1585   : > { %v2604_v33 = vpop.xlane.xlu1 %2603 }
0x1586   : > { %v2608_v4 = vmul.f32 0.03125, %v2604_v33 }
0x1588   : > { %v2610_v5 = vsub.f32 %v2600_v56, %v2608_v4  ;;  %v2737_v4 = vrot.slane %v4098_v26, %v1573_v50 }
0x1589   : > { %v2607_v8 = vpop.xlane.xlu1 %2606 }
0x158a   : > { %v2609_v14 = vmul.f32 0.03125, %v2607_v8  ;;  %v2612_v11 = vmul.f32 %v2610_v5, %v2610_v5 }
0x158c   : > { %v2611_v13 = vsub.f32 %v2601_v1, %v2609_v14  ;;  %v2614_v12 = vsel %vm449_vm0, %v2612_v11, 0.0 }
0x158d   : > { %2615 = vadd.xlane.f32.xlu1 %v2614_v12 }
0x158e   : > { %v2613_v51 = vmul.f32 %v2611_v13, %v2611_v13 }
0x1590   : > { %v2617_v15 = vsel %vm449_vm0, %v2613_v51, 0.0 }
0x1591   : > { %2618 = vadd.xlane.f32.xlu1 %v2617_v15 }
0x161a   : > { %v2616_v19 = vpop.xlane.xlu1 %2615 }
0x161b   : > { %v2620_v24 = vmul.f32 0.03125, %v2616_v19 }
0x161d   : > { %v2622_v25 = vadd.f32 1e-12, %v2620_v24 }
0x161e   : > { %v2619_v28 = vpop.xlane.xlu1 %2618 }
0x161f   : > { %3731 = vrsqrt.f32 %v2622_v25  ;;  %v2621_v29 = vmul.f32 0.03125, %v2619_v28 }
0x1621   : > { %v2623_v54 = vadd.f32 1e-12, %v2621_v29 }
0x1623   : > { %3733 = vrsqrt.f32 %v2623_v54 }
0x1629   : > { %v3732_v30 = vpop.eup %3731 }
0x162a   : > { %v2626_v22 = vmul.f32 %v3732_v30, %v2610_v5 }
0x162c   : > { %v2632_v35 = vmul.f32 %v2631_v31, %v2626_v22 }
0x162d   : > { %v3734_v34 = vpop.eup %3733 }
0x162e   : > { %v2627_v27 = vmul.f32 %v3734_v34, %v2611_v13  ;;  %v2638_v2 = vadd.f32 %v2637_v36, %v2632_v35  ;;  %v443_v34 = vld [vmem:[%s3879_s26 + $0x8] sm:$0xff]  ;;  %v444_v35 = vld [vmem:[%s3879_s26 + $0x10] sm:$0xff] }
0x1630   : > { %v2633_v37 = vmul.f32 %v2631_v31, %v2627_v27  ;;  %v3745_v27 = vld [vmem:[%s3879_s26] sm:$0xff] }
0x1632   : > { %v2639_v7 = vadd.f32 %v2637_v36, %v2633_v37  ;;  %v2861_v36 = vrot.slane %v3745_v27, 3  ;;  %v2862_v37 = vrot.slane %v443_v34, 3 }
0x1634   : > { %v2640_v38 = vpack.c.bf16 %v2639_v7, %v2638_v2 }
0x1636   : > { %3592 = vmatmul.mubr.msk.bf16.vlgmr.msra.gmra.mrb[68].mxu1 %vm449_vm0, %v2640_v38 }
0x1637   : > { %3615 = vmatprep.mubr.msk.f32.mxu1 %vm3755_vm1, %v3754_v16 }
0x1709   : > { %v2699_v48 = vpop.f32.mrb[68].mxu1 }
0x170a   : > { %v2700_v49 = vadd.f32 %v2699_v48, %v2649_v47  ;;  %v3593_v53 = vpop.f32.mrb[69].mxu1  ;;  %v2868_v48 = vrot.slane %v446_v45, 3 }
0x170b   : > { %v2702_v21 = vpop.f32.mrb[70].mxu1 }
0x170c   : > { %v2708_v55 = vmul.f32 0.044715, %v2700_v49  ;;  %v2703_v9 = vadd.f32 %v2702_v21, %v2649_v47  ;;  %v3594_v23 = vpop.f32.mrb[71].mxu1  ;;  %v2706_v0 = vmul.f32 0.5, %v2700_v49  ;;  %v2866_v47 = vrot.slane %v445_v44, 3 }
0x170e   : > { %v2710_v17 = vmul.f32 %v2708_v55, %v2700_v49  ;;  %v2709_v57 = vmul.f32 0.044715, %v2703_v9  ;;  %v2707_v56 = vmul.f32 0.5, %v2703_v9  ;;  %v2869_v53 = vsel %vm2860_vm6, %v2866_v47, %v2868_v48 }
0x1710   : > { %v2712_v58 = vmul.f32 %v2710_v17, %v2700_v49  ;;  %v2711_v59 = vmul.f32 %v2709_v57, %v2703_v9 }
0x1712   : > { %v2714_v46 = vadd.f32 %v2712_v58, %v2700_v49  ;;  %v2713_v61 = vmul.f32 %v2711_v59, %v2703_v9  ;;  %v2837_v59 = vrot.slane %v4098_v26, %v1674_v6  ;;  %v2854_v6 = vrot.slane %v3745_v27, %v4063_v10 }
0x1714   : > { %v2716_v62 = vmul.f32 0.7978846, %v2714_v46  ;;  %v2715_v16 = vadd.f32 %v2713_v61, %v2703_v9 }
0x1716   : > { %3735 = vtanh.f32 %v2716_v62  ;;  %v2717_v40 = vmul.f32 0.7978846, %v2715_v16  ;;  %v2843_v62 = vrot.slane %v4098_v26, %v1680_v39 }
0x1718   : > { %3737 = vtanh.f32 %v2717_v40 }
0x1720   : > { %v3736_v63 = vpop.eup %3735 }
0x1721   : > { %v2720_v32 = vadd.f32 1.0, %v3736_v63 }
0x1722   : > { %v3738_v41 = vpop.eup %3737 }
0x1723   : > { %v2721_v60 = vadd.f32 1.0, %v3738_v41  ;;  %v2722_v1 = vmul.f32 %v2720_v32, %v2706_v0 }
0x1725   : > { %v2723_v3 = vmul.f32 %v2721_v60, %v2707_v56 }
0x1727   : > { %v2724_v33 = vpack.c.bf16 %v2723_v3, %v2722_v1 }
0x1729   : > { %3604 = vmatmul.mubr.msk.bf16.vlgmr.msra.gmra.mrb[68].mxu0 %vm1599_vm5, %v2724_v33 }
0x17fc   : > { %v2799_v5 = vpop.f32.mrb[68].mxu0 }
0x17fd   : > { %v2800_v8 = vadd.f32 %v2799_v5, %v2737_v4  ;;  %v3605_v14 = vpop.f32.mrb[69].mxu0 }
0x17fe   : > { %v2802_v11 = vpop.f32.mrb[70].mxu0 }
0x17ff   : > { %v2803_v13 = vadd.f32 %v2802_v11, %v2737_v4  ;;  %v3606_v12 = vpop.f32.mrb[71].mxu0  ;;  %v2806_v51 = vadd.f32 %v2800_v8, %v2638_v2  ;;  %v2864_v2 = vrot.slane %v444_v35, 3 }
0x1801   : > { %v2808_v15 = vsel %vm449_vm0, %v2806_v51, 0.0  ;;  %v2807_v52 = vadd.f32 %v2803_v13, %v2639_v7  ;;  %v2863_v7 = vsel %vm2860_vm6, %v2861_v36, %v2862_v37  ;;  %v2865_v38 = vsel %vm2860_vm6, %v2862_v37, %v2864_v2 }
0x1802   : > { %2809 = vadd.xlane.f32.xlu0 %v2808_v15  ;;  %v3619_v42 = vpack.c.bf16 %v2865_v38, %v2863_v7  ;;  %v2867_v49 = vsel %vm2860_vm6, %v2864_v2, %v2866_v47 }
0x1803   : > { %v2811_v18 = vsel %vm449_vm0, %v2807_v52, 0.0  ;;  %v3622_v21 = vpack.c.bf16 %v2869_v53, %v2867_v49 }
0x1804   : > { %2812 = vadd.xlane.f32.xlu1 %v2811_v18  ;;  %3620 = vmatpush3.bf16.msra.mxu1 %v3619_v42 }
0x1805   : > { %3621 = vmatprep.subr.bf16.mxu1 %v3762_v43 }
0x1808   : > { %3623 = vmatpush3.bf16.msra.mxu1 %v3622_v21 }
0x188f   : > { %v2810_v19 = vpop.xlane.xlu0 %2809 }
0x1890   : > { %v2814_v24 = vmul.f32 0.03125, %v2810_v19 }
0x1891   : > { %v2813_v50 = vpop.xlane.xlu1 %2812 }
0x1892   : > { %v2815_v25 = vmul.f32 0.03125, %v2813_v50  ;;  %v2816_v28 = vsub.f32 %v2806_v51, %v2814_v24 }
0x1894   : > { %v2817_v29 = vsub.f32 %v2807_v52, %v2815_v25  ;;  %v2818_v31 = vmul.f32 %v2816_v28, %v2816_v28 }
0x1896   : > { %v2819_v54 = vmul.f32 %v2817_v29, %v2817_v29  ;;  %v2820_v22 = vsel %vm449_vm0, %v2818_v31, 0.0 }
0x1898   : > { %v2823_v30 = vsel %vm449_vm0, %v2819_v54, 0.0 }
0x1899   : > { %2824 = vadd.xlane.f32.xlu1 %v2823_v30 }
0x189d   : > { %2821 = vadd.xlane.f32.xlu1 %v2820_v22 }
0x1926   : > { %v2825_v55 = vpop.xlane.xlu1 %2824 }
0x1927   : > { %v2827_v9 = vmul.f32 0.03125, %v2825_v55 }
0x1929   : > { %v2829_v23 = vadd.f32 1e-12, %v2827_v9 }
0x192a   : > { %v2822_v17 = vpop.xlane.xlu1 %2821 }
0x192b   : > { %3739 = vrsqrt.f32 %v2829_v23  ;;  %v2826_v57 = vmul.f32 0.03125, %v2822_v17 }
0x192d   : > { %v2828_v58 = vadd.f32 1e-12, %v2826_v57 }
0x192f   : > { %3741 = vrsqrt.f32 %v2828_v58 }
0x1935   : > { %v3740_v46 = vpop.eup %3739 }
0x1936   : > { %v2833_v61 = vmul.f32 %v3740_v46, %v2817_v29 }
0x1938   : > { %v2839_v16 = vmul.f32 %v2837_v59, %v2833_v61 }
0x1939   : > { %v3742_v40 = vpop.eup %3741 }
0x193a   : > { %v2832_v63 = vmul.f32 %v3742_v40, %v2816_v28  ;;  %v2845_v32 = vadd.f32 %v2843_v62, %v2839_v16 }
0x193c   : > { %v2838_v41 = vmul.f32 %v2837_v59, %v2832_v63  ;;  %v2847_v56 = vrot.slane %v2845_v32, 7 }
0x193e   : > { %v2844_v0 = vadd.f32 %v2843_v62, %v2838_v41 }
0x1940   : > { %v2850_v60 = vsel %vm2849_vm7, %v2844_v0, %v2847_v56 }
0x1941   : > { %3616 = vmatmul.mubr.msk.f32.vlgmr.msra.gmra.mrb[72].mxu1 %vm449_vm0, %v2850_v60 }
0x1a14   : > { %v2943_v1 = vpop.f32.mrb[72].mxu1 }
0x1a15   : > { %v2944_v3 = vadd.f32 %v2943_v1, %v2854_v6  ;;  %v3617_v33 = vpop.f32.mrb[73].mxu1 }
0x1a17   : > { %3743 = vtanh.f32 %v2944_v3 }
0x1a21   : > { %v3744_v20 = vpop.eup %3743 }
0x1a22   : > { %2949 = vst.msk [vmem:[%s440_s21] sm:$0x3] %vm2948_vm8, %v3744_v20 }
0x1a23 PF: > { %s18_s27 = sadd.s32 1, %s3752_s27  }
0x1a24   : > { %p15_p4 = scmp.ge.s32.totalorder %s18_s27, 4  }
0x1a26   :  { %17 = sbr.rel (!%p15_p4) target bundleno = 1 (0x1), region = 120 }

</bundles_post_ra>
